<compile_context>
chip_gen: v7x
topology: tpu7x:2x2x1
jax: 0.10.0
libtpu: 0.0.40
codegen_flags: <defaults>
</compile_context>

<pallas_src>
import functools

import jax
import jax.numpy as jnp
from jax import lax
from jax.experimental import pallas as pl
from jax.experimental.pallas import tpu as pltpu


def _lstm_recurrence_kernel(gx_ref, whh_ref, y_ref, cn_ref, h_sc, c_sc,
                            *, hidden_size, time_chunk):
    """One (batch_block, time_chunk) slab of the LSTM recurrence.

    gx_ref : (Bb, Tc, 4H) f32  -- precomputed x @ W_ih^T + (b_ih + b_hh)
    whh_ref: (H, 4H)           -- W_hh^T (f32 or bf16)
    y_ref  : (Bb, Tc, H)       -- hidden-state outputs for this slab
    cn_ref : (Bb, H)           -- final cell state (written at last chunk)
    h_sc/c_sc: (Bb, H) f32     -- recurrent state, persists across time chunks
    """
    t_blk = pl.program_id(1)

    # Zero initial state (h_0 = c_0 = 0) at the start of every batch block.
    @pl.when(t_blk == 0)
    def _():
        h_sc[...] = jnp.zeros_like(h_sc)
        c_sc[...] = jnp.zeros_like(c_sc)

    H = hidden_size
    w_dtype = whh_ref.dtype

    def step(i, carry):
        h, c = carry
        # Only the recurrent matmul remains on the serial path.
        gx_t = gx_ref[:, pl.ds(i, 1), :][:, 0, :].astype(jnp.float32)
        gates = gx_t + jnp.dot(h.astype(w_dtype), whh_ref[...],
                               preferred_element_type=jnp.float32)
        # PyTorch gate ordering: input, forget, cell(g), output.
        # NOTE: for H < 128 these lane-offset slices relayout through the XLU
        # and y/c_n stores are masked; pad H to a multiple of 128 for large
        # problems if this becomes the bottleneck.
        i_g = jax.nn.sigmoid(gates[:, 0 * H:1 * H])
        f_g = jax.nn.sigmoid(gates[:, 1 * H:2 * H])
        g_g = jnp.tanh(gates[:, 2 * H:3 * H])
        o_g = jax.nn.sigmoid(gates[:, 3 * H:4 * H])
        c_new = f_g * c + i_g * g_g
        h_new = o_g * jnp.tanh(c_new)
        # Store into the VMEM output tile; HBM writeback happens once per
        # time chunk via the BlockSpec pipeline (batched stores).
        y_ref[:, pl.ds(i, 1), :] = h_new[:, None, :].astype(y_ref.dtype)
        return h_new, c_new

    h_f, c_f = lax.fori_loop(0, time_chunk, step, (h_sc[...], c_sc[...]),
                             unroll=True)
    h_sc[...] = h_f
    c_sc[...] = c_f

    @pl.when(t_blk == pl.num_programs(1) - 1)
    def _():
        cn_ref[...] = c_f.astype(cn_ref.dtype)


def _pick_time_chunk(seq_len, requested):
    """Largest legal time chunk <= requested.

    A partial (Tc < T) block needs Tc % 8 == 0 and Tc | T; otherwise fall back
    to the whole sequence in one block (block dim == full dim is always legal).
    """
    if seq_len <= requested:
        return seq_len
    tc = (requested // 8) * 8
    while tc >= 8:
        if seq_len % tc == 0:
            return tc
        tc -= 8
    return seq_len


def lstm_block_forward(x, w_ih, w_hh, b_ih, b_hh, *, hidden_size,
                       time_chunk=32, batch_block=None,
                       matmul_dtype=jnp.float32):
    """Single-layer batch_first LSTM, zero initial state (PyTorch semantics).

    x: (B, T, I);  w_ih: (4H, I);  w_hh: (4H, H);  b_ih, b_hh: (4H,)
    Returns (output (B, T, H), (h_n (1, B, H), c_n (1, B, H))).
    """
    B, T, I = x.shape
    H = hidden_size
    dtype = x.dtype

    if batch_block is None:
        batch_block = B          # no batch split (harmless on 1-TC chips)
    assert B % batch_block == 0, "batch_block must divide the batch size"
    Tc = _pick_time_chunk(T, time_chunk)

    # ---- hoisted input projection: one big (B*T, I) x (I, 4H) matmul ------
    bias = (b_ih + b_hh).astype(jnp.float32)
    gates_x = jnp.einsum(
        "bti,gi->btg",
        x.astype(matmul_dtype), w_ih.astype(matmul_dtype),
        preferred_element_type=jnp.float32) + bias            # (B, T, 4H) f32

    whh_t = jnp.transpose(w_hh, (1, 0)).astype(matmul_dtype)  # (H, 4H)

    kernel = functools.partial(_lstm_recurrence_kernel,
                               hidden_size=H, time_chunk=Tc)

    y, c_n = pl.pallas_call(
        kernel,
        out_shape=(
            jax.ShapeDtypeStruct((B, T, H), dtype),
            jax.ShapeDtypeStruct((B, H), dtype),
        ),
        grid_spec=pltpu.PrefetchScalarGridSpec(
            num_scalar_prefetch=0,
            grid=(B // batch_block, T // Tc),
            in_specs=[
                # Precomputed x-gates, streamed per (batch, time) slab.
                pl.BlockSpec((batch_block, Tc, 4 * H), lambda b, t: (b, t, 0)),
                # Constant recurrent weight tile.  For large H, additionally
                # single-buffer it (pipeline_mode=pl.Buffered(1)) and use
                # bf16 to shrink its VMEM footprint (v7x: 64 MiB / core).
                pl.BlockSpec((H, 4 * H), lambda b, t: (0, 0)),
            ],
            out_specs=[
                pl.BlockSpec((batch_block, Tc, H), lambda b, t: (b, t, 0)),
                pl.BlockSpec((batch_block, H), lambda b, t: (b, 0)),
            ],
            scratch_shapes=[
                pltpu.VMEM((batch_block, H), jnp.float32),     # h state
                pltpu.VMEM((batch_block, H), jnp.float32),     # c state
            ],
        ),
        compiler_params=pltpu.CompilerParams(
            # Batch blocks are independent -> megacore-parallel on v7x;
            # the time axis carries the recurrence -> arbitrary.
            dimension_semantics=("parallel", "arbitrary"),
            vmem_limit_bytes=32 * 1024 * 1024,
        ),
    )(gates_x, whh_t)

    h_n = y[:, -1, :]            # final hidden state == last output row
    return y, (h_n[None, ...], c_n[None, ...])


def _reference_lstm(x, w_ih, w_hh, b_ih, b_hh, hidden_size):
    """Pure-JAX reference implementing PyTorch's single-layer LSTM."""
    B, T, I = x.shape
    H = hidden_size
    h = jnp.zeros((B, H), jnp.float32)
    c = jnp.zeros((B, H), jnp.float32)
    ys = []
    for t in range(T):
        gates = x[:, t, :] @ w_ih.T + h @ w_hh.T + b_ih + b_hh
        i_g = jax.nn.sigmoid(gates[:, 0 * H:1 * H])
        f_g = jax.nn.sigmoid(gates[:, 1 * H:2 * H])
        g_g = jnp.tanh(gates[:, 2 * H:3 * H])
        o_g = jax.nn.sigmoid(gates[:, 3 * H:4 * H])
        c = f_g * c + i_g * g_g
        h = o_g * jnp.tanh(c)
        ys.append(h)
    y = jnp.stack(ys, axis=1)
    return y, (h[None], c[None])


if __name__ == "__main__":
    # Small shapes consistent with the module's forward:
    #   x: (batch=2, seq=8, input_size=4), hidden_size=32
    B, T, INPUT_SIZE, HIDDEN_SIZE = 2, 8, 4, 32

    key = jax.random.PRNGKey(0)
    k_x, k_wih, k_whh, k_bih, k_bhh = jax.random.split(key, 5)

    x = jax.random.normal(k_x, (B, T, INPUT_SIZE), dtype=jnp.float32)

    # Deterministic parameter init mirroring nn.LSTM: U(-1/sqrt(H), 1/sqrt(H))
    bound = 1.0 / (HIDDEN_SIZE ** 0.5)
    w_ih = jax.random.uniform(k_wih, (4 * HIDDEN_SIZE, INPUT_SIZE),
                              minval=-bound, maxval=bound, dtype=jnp.float32)
    w_hh = jax.random.uniform(k_whh, (4 * HIDDEN_SIZE, HIDDEN_SIZE),
                              minval=-bound, maxval=bound, dtype=jnp.float32)
    b_ih = jax.random.uniform(k_bih, (4 * HIDDEN_SIZE,),
                              minval=-bound, maxval=bound, dtype=jnp.float32)
    b_hh = jax.random.uniform(k_bhh, (4 * HIDDEN_SIZE,),
                              minval=-bound, maxval=bound, dtype=jnp.float32)

    # Pure-JAX reference of PyTorch LSTM semantics.
    y_ref, (h_ref, c_ref) = _reference_lstm(x, w_ih, w_hh, b_ih, b_hh,
                                            HIDDEN_SIZE)

    # 1) f32 path (tight tolerance).
    output, (h_n, c_n) = lstm_block_forward(
        x, w_ih, w_hh, b_ih, b_hh, hidden_size=HIDDEN_SIZE)
    jax.block_until_ready((output, h_n, c_n))
    assert output.shape == (B, T, HIDDEN_SIZE)
    assert h_n.shape == (1, B, HIDDEN_SIZE)
    assert c_n.shape == (1, B, HIDDEN_SIZE)
    assert jnp.allclose(output, y_ref, atol=1e-5, rtol=1e-5)
    assert jnp.allclose(h_n, h_ref, atol=1e-5, rtol=1e-5)
    assert jnp.allclose(c_n, c_ref, atol=1e-5, rtol=1e-5)

    # 2) batch-parallel path (batch_block=1 -> leading "parallel" grid axis
    #    of extent 2, as a v7x 2-TensorCore shard would use).
    out_bp, (h_bp, c_bp) = lstm_block_forward(
        x, w_ih, w_hh, b_ih, b_hh, hidden_size=HIDDEN_SIZE, batch_block=1)
    jax.block_until_ready((out_bp, h_bp, c_bp))
    assert jnp.allclose(out_bp, y_ref, atol=1e-5, rtol=1e-5)
    assert jnp.allclose(c_bp, c_ref, atol=1e-5, rtol=1e-5)

    # 3) bf16-matmul path (f32 accumulation / state): loose tolerance.
    out_bf, (h_bf, c_bf) = lstm_block_forward(
        x, w_ih, w_hh, b_ih, b_hh, hidden_size=HIDDEN_SIZE,
        matmul_dtype=jnp.bfloat16)
    jax.block_until_ready((out_bf, h_bf, c_bf))
    assert jnp.allclose(out_bf, y_ref, atol=1e-1, rtol=5e-2)
    assert jnp.allclose(c_bf, c_ref, atol=1e-1, rtol=5e-2)

    print("KERNEL_OK")
</pallas_src>

<mosaic_0001>
module attributes {stable_mosaic.version = 11 : i64} {
  func.func @_lstm_recurrence_kernel(%arg0: i32, %arg1: i32, %arg2: memref<2x8x128xf32, #tpu.memory_space<vmem>>, %arg3: memref<32x128xf32, #tpu.memory_space<vmem>>, %arg4: memref<2x8x32xf32, #tpu.memory_space<vmem>>, %arg5: memref<2x32xf32, #tpu.memory_space<vmem>>, %arg6: memref<2x32xf32, #tpu.memory_space<vmem>>, %arg7: memref<2x32xf32, #tpu.memory_space<vmem>>) attributes {dimension_semantics = [#tpu.dimension_semantics<parallel>, #tpu.dimension_semantics<arbitrary>], iteration_bounds = array<i64: 1, 1>, scalar_prefetch = 0 : i64, scratch_operands = 2 : i64, tpu.core_type = #tpu.core_type<tc>, window_params = [{transform_indices = @transform_0, window_bounds = array<i64: 2, 8, 128>}, {pipeline_mode = #tpu.pipeline_mode<synchronous>, transform_indices = @transform_1, window_bounds = array<i64: 32, 128>}, {transform_indices = @transform_2, window_bounds = array<i64: 2, 8, 32>}, {transform_indices = @transform_3, window_bounds = array<i64: 2, 32>}]} {
    %c0_i32 = arith.constant 0 : i32
    %0 = arith.cmpi eq, %arg1, %c0_i32 : i32
    %1 = arith.extui %0 : i1 to i32
    %c0_i32_0 = arith.constant 0 : i32
    %2 = arith.cmpi ne, %1, %c0_i32_0 : i32
    scf.if %2 {
      %cst_90 = arith.constant 0.000000e+00 : f32
      %282 = vector.broadcast %cst_90 : f32 to vector<2x32xf32>
      %c0_91 = arith.constant 0 : index
      %c0_92 = arith.constant 0 : index
      %283 = vector.load %arg6[%c0_91, %c0_92] : memref<2x32xf32, #tpu.memory_space<vmem>>, vector<2x32xf32>
      tpu.vector_store %arg6[%c0_91, %c0_92], %282 {strides = array<i32>} : memref<2x32xf32, #tpu.memory_space<vmem>>, vector<2x32xf32>,
      %cst_93 = arith.constant 0.000000e+00 : f32
      %284 = vector.broadcast %cst_93 : f32 to vector<2x32xf32>
      %c0_94 = arith.constant 0 : index
      %c0_95 = arith.constant 0 : index
      %285 = vector.load %arg7[%c0_94, %c0_95] : memref<2x32xf32, #tpu.memory_space<vmem>>, vector<2x32xf32>
      tpu.vector_store %arg7[%c0_94, %c0_95], %284 {strides = array<i32>} : memref<2x32xf32, #tpu.memory_space<vmem>>, vector<2x32xf32>,
    } else {
    }
    %c0 = arith.constant 0 : index
    %c0_1 = arith.constant 0 : index
    %3 = vector.load %arg6[%c0, %c0_1] : memref<2x32xf32, #tpu.memory_space<vmem>>, vector<2x32xf32>
    %c0_2 = arith.constant 0 : index
    %c0_3 = arith.constant 0 : index
    %4 = vector.load %arg7[%c0_2, %c0_3] : memref<2x32xf32, #tpu.memory_space<vmem>>, vector<2x32xf32>
    %c0_i32_4 = arith.constant 0 : i32
    %c0_5 = arith.constant 0 : index
    %5 = arith.index_cast %c0_i32_4 : i32 to index
    %c0_6 = arith.constant 0 : index
    %6 = vector.load %arg2[%c0_5, %5, %c0_6] : memref<2x8x128xf32, #tpu.memory_space<vmem>>, vector<2x1x128xf32>
    %7 = vector.shape_cast %6 : vector<2x1x128xf32> to vector<2x128xf32>
    %c0_7 = arith.constant 0 : index
    %c0_8 = arith.constant 0 : index
    %8 = vector.load %arg3[%c0_7, %c0_8] : memref<32x128xf32, #tpu.memory_space<vmem>>, vector<32x128xf32>
    %cst = arith.constant dense<0.000000e+00> : vector<2x128xf32>
    %9 = tpu.matmul %3, %8, %cst {dimension_numbers = #tpu.dot_dimension_numbers<[1], [0], [0], [1], [0, 0, 1, 1], [], []>} : vector<2x32xf32>, vector<32x128xf32>, vector<2x128xf32> -> vector<2x128xf32>
    %10 = arith.addf %7, %9 : vector<2x128xf32>
    %11 = vector.extract_strided_slice %10 {offsets = [0, 0], sizes = [2, 32], strides = [1, 1]} : vector<2x128xf32> to vector<2x32xf32>
    %12 = arith.negf %11 : vector<2x32xf32>
    %13 = math.exp %12 : vector<2x32xf32>
    %cst_9 = arith.constant 1.000000e+00 : f32
    %14 = vector.broadcast %cst_9 : f32 to vector<2x32xf32>
    %15 = arith.addf %14, %13 : vector<2x32xf32>
    %16 = arith.divf %14, %15 : vector<2x32xf32>
    %17 = vector.extract_strided_slice %10 {offsets = [0, 32], sizes = [2, 32], strides = [1, 1]} : vector<2x128xf32> to vector<2x32xf32>
    %18 = arith.negf %17 : vector<2x32xf32>
    %19 = math.exp %18 : vector<2x32xf32>
    %cst_10 = arith.constant 1.000000e+00 : f32
    %20 = vector.broadcast %cst_10 : f32 to vector<2x32xf32>
    %21 = arith.addf %20, %19 : vector<2x32xf32>
    %22 = arith.divf %20, %21 : vector<2x32xf32>
    %23 = vector.extract_strided_slice %10 {offsets = [0, 64], sizes = [2, 32], strides = [1, 1]} : vector<2x128xf32> to vector<2x32xf32>
    %24 = math.tanh %23 : vector<2x32xf32>
    %25 = vector.extract_strided_slice %10 {offsets = [0, 96], sizes = [2, 32], strides = [1, 1]} : vector<2x128xf32> to vector<2x32xf32>
    %26 = arith.negf %25 : vector<2x32xf32>
    %27 = math.exp %26 : vector<2x32xf32>
    %cst_11 = arith.constant 1.000000e+00 : f32
    %28 = vector.broadcast %cst_11 : f32 to vector<2x32xf32>
    %29 = arith.addf %28, %27 : vector<2x32xf32>
    %30 = arith.divf %28, %29 : vector<2x32xf32>
    %31 = arith.mulf %22, %4 : vector<2x32xf32>
    %32 = arith.mulf %16, %24 : vector<2x32xf32>
    %33 = arith.addf %31, %32 : vector<2x32xf32>
    %34 = math.tanh %33 : vector<2x32xf32>
    %35 = arith.mulf %30, %34 : vector<2x32xf32>
    %36 = vector.shape_cast %35 : vector<2x32xf32> to vector<2x1x32xf32>
    %c0_12 = arith.constant 0 : index
    %37 = arith.index_cast %c0_i32_4 : i32 to index
    %c0_13 = arith.constant 0 : index
    %38 = vector.load %arg4[%c0_12, %37, %c0_13] : memref<2x8x32xf32, #tpu.memory_space<vmem>>, vector<2x1x32xf32>
    tpu.vector_store %arg4[%c0_12, %37, %c0_13], %36 {strides = array<i32>} : memref<2x8x32xf32, #tpu.memory_space<vmem>>, vector<2x1x32xf32>,
    %c1_i32 = arith.constant 1 : i32
    %c0_14 = arith.constant 0 : index
    %39 = arith.index_cast %c1_i32 : i32 to index
    %c0_15 = arith.constant 0 : index
    %40 = vector.load %arg2[%c0_14, %39, %c0_15] : memref<2x8x128xf32, #tpu.memory_space<vmem>>, vector<2x1x128xf32>
    %41 = vector.shape_cast %40 : vector<2x1x128xf32> to vector<2x128xf32>
    %c0_16 = arith.constant 0 : index
    %c0_17 = arith.constant 0 : index
    %42 = vector.load %arg3[%c0_16, %c0_17] : memref<32x128xf32, #tpu.memory_space<vmem>>, vector<32x128xf32>
    %cst_18 = arith.constant dense<0.000000e+00> : vector<2x128xf32>
    %43 = tpu.matmul %35, %42, %cst_18 {dimension_numbers = #tpu.dot_dimension_numbers<[1], [0], [0], [1], [0, 0, 1, 1], [], []>} : vector<2x32xf32>, vector<32x128xf32>, vector<2x128xf32> -> vector<2x128xf32>
    %44 = arith.addf %41, %43 : vector<2x128xf32>
    %45 = vector.extract_strided_slice %44 {offsets = [0, 0], sizes = [2, 32], strides = [1, 1]} : vector<2x128xf32> to vector<2x32xf32>
    %46 = arith.negf %45 : vector<2x32xf32>
    %47 = math.exp %46 : vector<2x32xf32>
    %cst_19 = arith.constant 1.000000e+00 : f32
    %48 = vector.broadcast %cst_19 : f32 to vector<2x32xf32>
    %49 = arith.addf %48, %47 : vector<2x32xf32>
    %50 = arith.divf %48, %49 : vector<2x32xf32>
    %51 = vector.extract_strided_slice %44 {offsets = [0, 32], sizes = [2, 32], strides = [1, 1]} : vector<2x128xf32> to vector<2x32xf32>
    %52 = arith.negf %51 : vector<2x32xf32>
    %53 = math.exp %52 : vector<2x32xf32>
    %cst_20 = arith.constant 1.000000e+00 : f32
    %54 = vector.broadcast %cst_20 : f32 to vector<2x32xf32>
    %55 = arith.addf %54, %53 : vector<2x32xf32>
    %56 = arith.divf %54, %55 : vector<2x32xf32>
    %57 = vector.extract_strided_slice %44 {offsets = [0, 64], sizes = [2, 32], strides = [1, 1]} : vector<2x128xf32> to vector<2x32xf32>
    %58 = math.tanh %57 : vector<2x32xf32>
    %59 = vector.extract_strided_slice %44 {offsets = [0, 96], sizes = [2, 32], strides = [1, 1]} : vector<2x128xf32> to vector<2x32xf32>
    %60 = arith.negf %59 : vector<2x32xf32>
    %61 = math.exp %60 : vector<2x32xf32>
    %cst_21 = arith.constant 1.000000e+00 : f32
    %62 = vector.broadcast %cst_21 : f32 to vector<2x32xf32>
    %63 = arith.addf %62, %61 : vector<2x32xf32>
    %64 = arith.divf %62, %63 : vector<2x32xf32>
    %65 = arith.mulf %56, %33 : vector<2x32xf32>
    %66 = arith.mulf %50, %58 : vector<2x32xf32>
    %67 = arith.addf %65, %66 : vector<2x32xf32>
    %68 = math.tanh %67 : vector<2x32xf32>
    %69 = arith.mulf %64, %68 : vector<2x32xf32>
    %70 = vector.shape_cast %69 : vector<2x32xf32> to vector<2x1x32xf32>
    %c0_22 = arith.constant 0 : index
    %71 = arith.index_cast %c1_i32 : i32 to index
    %c0_23 = arith.constant 0 : index
    %72 = vector.load %arg4[%c0_22, %71, %c0_23] : memref<2x8x32xf32, #tpu.memory_space<vmem>>, vector<2x1x32xf32>
    tpu.vector_store %arg4[%c0_22, %71, %c0_23], %70 {strides = array<i32>} : memref<2x8x32xf32, #tpu.memory_space<vmem>>, vector<2x1x32xf32>,
    %c2_i32 = arith.constant 2 : i32
    %c0_24 = arith.constant 0 : index
    %73 = arith.index_cast %c2_i32 : i32 to index
    %c0_25 = arith.constant 0 : index
    %74 = vector.load %arg2[%c0_24, %73, %c0_25] : memref<2x8x128xf32, #tpu.memory_space<vmem>>, vector<2x1x128xf32>
    %75 = vector.shape_cast %74 : vector<2x1x128xf32> to vector<2x128xf32>
    %c0_26 = arith.constant 0 : index
    %c0_27 = arith.constant 0 : index
    %76 = vector.load %arg3[%c0_26, %c0_27] : memref<32x128xf32, #tpu.memory_space<vmem>>, vector<32x128xf32>
    %cst_28 = arith.constant dense<0.000000e+00> : vector<2x128xf32>
    %77 = tpu.matmul %69, %76, %cst_28 {dimension_numbers = #tpu.dot_dimension_numbers<[1], [0], [0], [1], [0, 0, 1, 1], [], []>} : vector<2x32xf32>, vector<32x128xf32>, vector<2x128xf32> -> vector<2x128xf32>
    %78 = arith.addf %75, %77 : vector<2x128xf32>
    %79 = vector.extract_strided_slice %78 {offsets = [0, 0], sizes = [2, 32], strides = [1, 1]} : vector<2x128xf32> to vector<2x32xf32>
    %80 = arith.negf %79 : vector<2x32xf32>
    %81 = math.exp %80 : vector<2x32xf32>
    %cst_29 = arith.constant 1.000000e+00 : f32
    %82 = vector.broadcast %cst_29 : f32 to vector<2x32xf32>
    %83 = arith.addf %82, %81 : vector<2x32xf32>
    %84 = arith.divf %82, %83 : vector<2x32xf32>
    %85 = vector.extract_strided_slice %78 {offsets = [0, 32], sizes = [2, 32], strides = [1, 1]} : vector<2x128xf32> to vector<2x32xf32>
    %86 = arith.negf %85 : vector<2x32xf32>
    %87 = math.exp %86 : vector<2x32xf32>
    %cst_30 = arith.constant 1.000000e+00 : f32
    %88 = vector.broadcast %cst_30 : f32 to vector<2x32xf32>
    %89 = arith.addf %88, %87 : vector<2x32xf32>
    %90 = arith.divf %88, %89 : vector<2x32xf32>
    %91 = vector.extract_strided_slice %78 {offsets = [0, 64], sizes = [2, 32], strides = [1, 1]} : vector<2x128xf32> to vector<2x32xf32>
    %92 = math.tanh %91 : vector<2x32xf32>
    %93 = vector.extract_strided_slice %78 {offsets = [0, 96], sizes = [2, 32], strides = [1, 1]} : vector<2x128xf32> to vector<2x32xf32>
    %94 = arith.negf %93 : vector<2x32xf32>
    %95 = math.exp %94 : vector<2x32xf32>
    %cst_31 = arith.constant 1.000000e+00 : f32
    %96 = vector.broadcast %cst_31 : f32 to vector<2x32xf32>
    %97 = arith.addf %96, %95 : vector<2x32xf32>
    %98 = arith.divf %96, %97 : vector<2x32xf32>
    %99 = arith.mulf %90, %67 : vector<2x32xf32>
    %100 = arith.mulf %84, %92 : vector<2x32xf32>
    %101 = arith.addf %99, %100 : vector<2x32xf32>
    %102 = math.tanh %101 : vector<2x32xf32>
    %103 = arith.mulf %98, %102 : vector<2x32xf32>
    %104 = vector.shape_cast %103 : vector<2x32xf32> to vector<2x1x32xf32>
    %c0_32 = arith.constant 0 : index
    %105 = arith.index_cast %c2_i32 : i32 to index
    %c0_33 = arith.constant 0 : index
    %106 = vector.load %arg4[%c0_32, %105, %c0_33] : memref<2x8x32xf32, #tpu.memory_space<vmem>>, vector<2x1x32xf32>
    tpu.vector_store %arg4[%c0_32, %105, %c0_33], %104 {strides = array<i32>} : memref<2x8x32xf32, #tpu.memory_space<vmem>>, vector<2x1x32xf32>,
    %c3_i32 = arith.constant 3 : i32
    %c0_34 = arith.constant 0 : index
    %107 = arith.index_cast %c3_i32 : i32 to index
    %c0_35 = arith.constant 0 : index
    %108 = vector.load %arg2[%c0_34, %107, %c0_35] : memref<2x8x128xf32, #tpu.memory_space<vmem>>, vector<2x1x128xf32>
    %109 = vector.shape_cast %108 : vector<2x1x128xf32> to vector<2x128xf32>
    %c0_36 = arith.constant 0 : index
    %c0_37 = arith.constant 0 : index
    %110 = vector.load %arg3[%c0_36, %c0_37] : memref<32x128xf32, #tpu.memory_space<vmem>>, vector<32x128xf32>
    %cst_38 = arith.constant dense<0.000000e+00> : vector<2x128xf32>
    %111 = tpu.matmul %103, %110, %cst_38 {dimension_numbers = #tpu.dot_dimension_numbers<[1], [0], [0], [1], [0, 0, 1, 1], [], []>} : vector<2x32xf32>, vector<32x128xf32>, vector<2x128xf32> -> vector<2x128xf32>
    %112 = arith.addf %109, %111 : vector<2x128xf32>
    %113 = vector.extract_strided_slice %112 {offsets = [0, 0], sizes = [2, 32], strides = [1, 1]} : vector<2x128xf32> to vector<2x32xf32>
    %114 = arith.negf %113 : vector<2x32xf32>
    %115 = math.exp %114 : vector<2x32xf32>
    %cst_39 = arith.constant 1.000000e+00 : f32
    %116 = vector.broadcast %cst_39 : f32 to vector<2x32xf32>
    %117 = arith.addf %116, %115 : vector<2x32xf32>
    %118 = arith.divf %116, %117 : vector<2x32xf32>
    %119 = vector.extract_strided_slice %112 {offsets = [0, 32], sizes = [2, 32], strides = [1, 1]} : vector<2x128xf32> to vector<2x32xf32>
    %120 = arith.negf %119 : vector<2x32xf32>
    %121 = math.exp %120 : vector<2x32xf32>
    %cst_40 = arith.constant 1.000000e+00 : f32
    %122 = vector.broadcast %cst_40 : f32 to vector<2x32xf32>
    %123 = arith.addf %122, %121 : vector<2x32xf32>
    %124 = arith.divf %122, %123 : vector<2x32xf32>
    %125 = vector.extract_strided_slice %112 {offsets = [0, 64], sizes = [2, 32], strides = [1, 1]} : vector<2x128xf32> to vector<2x32xf32>
    %126 = math.tanh %125 : vector<2x32xf32>
    %127 = vector.extract_strided_slice %112 {offsets = [0, 96], sizes = [2, 32], strides = [1, 1]} : vector<2x128xf32> to vector<2x32xf32>
    %128 = arith.negf %127 : vector<2x32xf32>
    %129 = math.exp %128 : vector<2x32xf32>
    %cst_41 = arith.constant 1.000000e+00 : f32
    %130 = vector.broadcast %cst_41 : f32 to vector<2x32xf32>
    %131 = arith.addf %130, %129 : vector<2x32xf32>
    %132 = arith.divf %130, %131 : vector<2x32xf32>
    %133 = arith.mulf %124, %101 : vector<2x32xf32>
    %134 = arith.mulf %118, %126 : vector<2x32xf32>
    %135 = arith.addf %133, %134 : vector<2x32xf32>
    %136 = math.tanh %135 : vector<2x32xf32>
    %137 = arith.mulf %132, %136 : vector<2x32xf32>
    %138 = vector.shape_cast %137 : vector<2x32xf32> to vector<2x1x32xf32>
    %c0_42 = arith.constant 0 : index
    %139 = arith.index_cast %c3_i32 : i32 to index
    %c0_43 = arith.constant 0 : index
    %140 = vector.load %arg4[%c0_42, %139, %c0_43] : memref<2x8x32xf32, #tpu.memory_space<vmem>>, vector<2x1x32xf32>
    tpu.vector_store %arg4[%c0_42, %139, %c0_43], %138 {strides = array<i32>} : memref<2x8x32xf32, #tpu.memory_space<vmem>>, vector<2x1x32xf32>,
    %c4_i32 = arith.constant 4 : i32
    %c0_44 = arith.constant 0 : index
    %141 = arith.index_cast %c4_i32 : i32 to index
    %c0_45 = arith.constant 0 : index
    %142 = vector.load %arg2[%c0_44, %141, %c0_45] : memref<2x8x128xf32, #tpu.memory_space<vmem>>, vector<2x1x128xf32>
    %143 = vector.shape_cast %142 : vector<2x1x128xf32> to vector<2x128xf32>
    %c0_46 = arith.constant 0 : index
    %c0_47 = arith.constant 0 : index
    %144 = vector.load %arg3[%c0_46, %c0_47] : memref<32x128xf32, #tpu.memory_space<vmem>>, vector<32x128xf32>
    %cst_48 = arith.constant dense<0.000000e+00> : vector<2x128xf32>
    %145 = tpu.matmul %137, %144, %cst_48 {dimension_numbers = #tpu.dot_dimension_numbers<[1], [0], [0], [1], [0, 0, 1, 1], [], []>} : vector<2x32xf32>, vector<32x128xf32>, vector<2x128xf32> -> vector<2x128xf32>
    %146 = arith.addf %143, %145 : vector<2x128xf32>
    %147 = vector.extract_strided_slice %146 {offsets = [0, 0], sizes = [2, 32], strides = [1, 1]} : vector<2x128xf32> to vector<2x32xf32>
    %148 = arith.negf %147 : vector<2x32xf32>
    %149 = math.exp %148 : vector<2x32xf32>
    %cst_49 = arith.constant 1.000000e+00 : f32
    %150 = vector.broadcast %cst_49 : f32 to vector<2x32xf32>
    %151 = arith.addf %150, %149 : vector<2x32xf32>
    %152 = arith.divf %150, %151 : vector<2x32xf32>
    %153 = vector.extract_strided_slice %146 {offsets = [0, 32], sizes = [2, 32], strides = [1, 1]} : vector<2x128xf32> to vector<2x32xf32>
    %154 = arith.negf %153 : vector<2x32xf32>
    %155 = math.exp %154 : vector<2x32xf32>
    %cst_50 = arith.constant 1.000000e+00 : f32
    %156 = vector.broadcast %cst_50 : f32 to vector<2x32xf32>
    %157 = arith.addf %156, %155 : vector<2x32xf32>
    %158 = arith.divf %156, %157 : vector<2x32xf32>
    %159 = vector.extract_strided_slice %146 {offsets = [0, 64], sizes = [2, 32], strides = [1, 1]} : vector<2x128xf32> to vector<2x32xf32>
    %160 = math.tanh %159 : vector<2x32xf32>
    %161 = vector.extract_strided_slice %146 {offsets = [0, 96], sizes = [2, 32], strides = [1, 1]} : vector<2x128xf32> to vector<2x32xf32>
    %162 = arith.negf %161 : vector<2x32xf32>
    %163 = math.exp %162 : vector<2x32xf32>
    %cst_51 = arith.constant 1.000000e+00 : f32
    %164 = vector.broadcast %cst_51 : f32 to vector<2x32xf32>
    %165 = arith.addf %164, %163 : vector<2x32xf32>
    %166 = arith.divf %164, %165 : vector<2x32xf32>
    %167 = arith.mulf %158, %135 : vector<2x32xf32>
    %168 = arith.mulf %152, %160 : vector<2x32xf32>
    %169 = arith.addf %167, %168 : vector<2x32xf32>
    %170 = math.tanh %169 : vector<2x32xf32>
    %171 = arith.mulf %166, %170 : vector<2x32xf32>
    %172 = vector.shape_cast %171 : vector<2x32xf32> to vector<2x1x32xf32>
    %c0_52 = arith.constant 0 : index
    %173 = arith.index_cast %c4_i32 : i32 to index
    %c0_53 = arith.constant 0 : index
    %174 = vector.load %arg4[%c0_52, %173, %c0_53] : memref<2x8x32xf32, #tpu.memory_space<vmem>>, vector<2x1x32xf32>
    tpu.vector_store %arg4[%c0_52, %173, %c0_53], %172 {strides = array<i32>} : memref<2x8x32xf32, #tpu.memory_space<vmem>>, vector<2x1x32xf32>,
    %c5_i32 = arith.constant 5 : i32
    %c0_54 = arith.constant 0 : index
    %175 = arith.index_cast %c5_i32 : i32 to index
    %c0_55 = arith.constant 0 : index
    %176 = vector.load %arg2[%c0_54, %175, %c0_55] : memref<2x8x128xf32, #tpu.memory_space<vmem>>, vector<2x1x128xf32>
    %177 = vector.shape_cast %176 : vector<2x1x128xf32> to vector<2x128xf32>
    %c0_56 = arith.constant 0 : index
    %c0_57 = arith.constant 0 : index
    %178 = vector.load %arg3[%c0_56, %c0_57] : memref<32x128xf32, #tpu.memory_space<vmem>>, vector<32x128xf32>
    %cst_58 = arith.constant dense<0.000000e+00> : vector<2x128xf32>
    %179 = tpu.matmul %171, %178, %cst_58 {dimension_numbers = #tpu.dot_dimension_numbers<[1], [0], [0], [1], [0, 0, 1, 1], [], []>} : vector<2x32xf32>, vector<32x128xf32>, vector<2x128xf32> -> vector<2x128xf32>
    %180 = arith.addf %177, %179 : vector<2x128xf32>
    %181 = vector.extract_strided_slice %180 {offsets = [0, 0], sizes = [2, 32], strides = [1, 1]} : vector<2x128xf32> to vector<2x32xf32>
    %182 = arith.negf %181 : vector<2x32xf32>
    %183 = math.exp %182 : vector<2x32xf32>
    %cst_59 = arith.constant 1.000000e+00 : f32
    %184 = vector.broadcast %cst_59 : f32 to vector<2x32xf32>
    %185 = arith.addf %184, %183 : vector<2x32xf32>
    %186 = arith.divf %184, %185 : vector<2x32xf32>
    %187 = vector.extract_strided_slice %180 {offsets = [0, 32], sizes = [2, 32], strides = [1, 1]} : vector<2x128xf32> to vector<2x32xf32>
    %188 = arith.negf %187 : vector<2x32xf32>
    %189 = math.exp %188 : vector<2x32xf32>
    %cst_60 = arith.constant 1.000000e+00 : f32
    %190 = vector.broadcast %cst_60 : f32 to vector<2x32xf32>
    %191 = arith.addf %190, %189 : vector<2x32xf32>
    %192 = arith.divf %190, %191 : vector<2x32xf32>
    %193 = vector.extract_strided_slice %180 {offsets = [0, 64], sizes = [2, 32], strides = [1, 1]} : vector<2x128xf32> to vector<2x32xf32>
    %194 = math.tanh %193 : vector<2x32xf32>
    %195 = vector.extract_strided_slice %180 {offsets = [0, 96], sizes = [2, 32], strides = [1, 1]} : vector<2x128xf32> to vector<2x32xf32>
    %196 = arith.negf %195 : vector<2x32xf32>
    %197 = math.exp %196 : vector<2x32xf32>
    %cst_61 = arith.constant 1.000000e+00 : f32
    %198 = vector.broadcast %cst_61 : f32 to vector<2x32xf32>
    %199 = arith.addf %198, %197 : vector<2x32xf32>
    %200 = arith.divf %198, %199 : vector<2x32xf32>
    %201 = arith.mulf %192, %169 : vector<2x32xf32>
    %202 = arith.mulf %186, %194 : vector<2x32xf32>
    %203 = arith.addf %201, %202 : vector<2x32xf32>
    %204 = math.tanh %203 : vector<2x32xf32>
    %205 = arith.mulf %200, %204 : vector<2x32xf32>
    %206 = vector.shape_cast %205 : vector<2x32xf32> to vector<2x1x32xf32>
    %c0_62 = arith.constant 0 : index
    %207 = arith.index_cast %c5_i32 : i32 to index
    %c0_63 = arith.constant 0 : index
    %208 = vector.load %arg4[%c0_62, %207, %c0_63] : memref<2x8x32xf32, #tpu.memory_space<vmem>>, vector<2x1x32xf32>
    tpu.vector_store %arg4[%c0_62, %207, %c0_63], %206 {strides = array<i32>} : memref<2x8x32xf32, #tpu.memory_space<vmem>>, vector<2x1x32xf32>,
    %c6_i32 = arith.constant 6 : i32
    %c0_64 = arith.constant 0 : index
    %209 = arith.index_cast %c6_i32 : i32 to index
    %c0_65 = arith.constant 0 : index
    %210 = vector.load %arg2[%c0_64, %209, %c0_65] : memref<2x8x128xf32, #tpu.memory_space<vmem>>, vector<2x1x128xf32>
    %211 = vector.shape_cast %210 : vector<2x1x128xf32> to vector<2x128xf32>
    %c0_66 = arith.constant 0 : index
    %c0_67 = arith.constant 0 : index
    %212 = vector.load %arg3[%c0_66, %c0_67] : memref<32x128xf32, #tpu.memory_space<vmem>>, vector<32x128xf32>
    %cst_68 = arith.constant dense<0.000000e+00> : vector<2x128xf32>
    %213 = tpu.matmul %205, %212, %cst_68 {dimension_numbers = #tpu.dot_dimension_numbers<[1], [0], [0], [1], [0, 0, 1, 1], [], []>} : vector<2x32xf32>, vector<32x128xf32>, vector<2x128xf32> -> vector<2x128xf32>
    %214 = arith.addf %211, %213 : vector<2x128xf32>
    %215 = vector.extract_strided_slice %214 {offsets = [0, 0], sizes = [2, 32], strides = [1, 1]} : vector<2x128xf32> to vector<2x32xf32>
    %216 = arith.negf %215 : vector<2x32xf32>
    %217 = math.exp %216 : vector<2x32xf32>
    %cst_69 = arith.constant 1.000000e+00 : f32
    %218 = vector.broadcast %cst_69 : f32 to vector<2x32xf32>
    %219 = arith.addf %218, %217 : vector<2x32xf32>
    %220 = arith.divf %218, %219 : vector<2x32xf32>
    %221 = vector.extract_strided_slice %214 {offsets = [0, 32], sizes = [2, 32], strides = [1, 1]} : vector<2x128xf32> to vector<2x32xf32>
    %222 = arith.negf %221 : vector<2x32xf32>
    %223 = math.exp %222 : vector<2x32xf32>
    %cst_70 = arith.constant 1.000000e+00 : f32
    %224 = vector.broadcast %cst_70 : f32 to vector<2x32xf32>
    %225 = arith.addf %224, %223 : vector<2x32xf32>
    %226 = arith.divf %224, %225 : vector<2x32xf32>
    %227 = vector.extract_strided_slice %214 {offsets = [0, 64], sizes = [2, 32], strides = [1, 1]} : vector<2x128xf32> to vector<2x32xf32>
    %228 = math.tanh %227 : vector<2x32xf32>
    %229 = vector.extract_strided_slice %214 {offsets = [0, 96], sizes = [2, 32], strides = [1, 1]} : vector<2x128xf32> to vector<2x32xf32>
    %230 = arith.negf %229 : vector<2x32xf32>
    %231 = math.exp %230 : vector<2x32xf32>
    %cst_71 = arith.constant 1.000000e+00 : f32
    %232 = vector.broadcast %cst_71 : f32 to vector<2x32xf32>
    %233 = arith.addf %232, %231 : vector<2x32xf32>
    %234 = arith.divf %232, %233 : vector<2x32xf32>
    %235 = arith.mulf %226, %203 : vector<2x32xf32>
    %236 = arith.mulf %220, %228 : vector<2x32xf32>
    %237 = arith.addf %235, %236 : vector<2x32xf32>
    %238 = math.tanh %237 : vector<2x32xf32>
    %239 = arith.mulf %234, %238 : vector<2x32xf32>
    %240 = vector.shape_cast %239 : vector<2x32xf32> to vector<2x1x32xf32>
    %c0_72 = arith.constant 0 : index
    %241 = arith.index_cast %c6_i32 : i32 to index
    %c0_73 = arith.constant 0 : index
    %242 = vector.load %arg4[%c0_72, %241, %c0_73] : memref<2x8x32xf32, #tpu.memory_space<vmem>>, vector<2x1x32xf32>
    tpu.vector_store %arg4[%c0_72, %241, %c0_73], %240 {strides = array<i32>} : memref<2x8x32xf32, #tpu.memory_space<vmem>>, vector<2x1x32xf32>,
    %c7_i32 = arith.constant 7 : i32
    %c0_74 = arith.constant 0 : index
    %243 = arith.index_cast %c7_i32 : i32 to index
    %c0_75 = arith.constant 0 : index
    %244 = vector.load %arg2[%c0_74, %243, %c0_75] : memref<2x8x128xf32, #tpu.memory_space<vmem>>, vector<2x1x128xf32>
    %245 = vector.shape_cast %244 : vector<2x1x128xf32> to vector<2x128xf32>
    %c0_76 = arith.constant 0 : index
    %c0_77 = arith.constant 0 : index
    %246 = vector.load %arg3[%c0_76, %c0_77] : memref<32x128xf32, #tpu.memory_space<vmem>>, vector<32x128xf32>
    %cst_78 = arith.constant dense<0.000000e+00> : vector<2x128xf32>
    %247 = tpu.matmul %239, %246, %cst_78 {dimension_numbers = #tpu.dot_dimension_numbers<[1], [0], [0], [1], [0, 0, 1, 1], [], []>} : vector<2x32xf32>, vector<32x128xf32>, vector<2x128xf32> -> vector<2x128xf32>
    %248 = arith.addf %245, %247 : vector<2x128xf32>
    %249 = vector.extract_strided_slice %248 {offsets = [0, 0], sizes = [2, 32], strides = [1, 1]} : vector<2x128xf32> to vector<2x32xf32>
    %250 = arith.negf %249 : vector<2x32xf32>
    %251 = math.exp %250 : vector<2x32xf32>
    %cst_79 = arith.constant 1.000000e+00 : f32
    %252 = vector.broadcast %cst_79 : f32 to vector<2x32xf32>
    %253 = arith.addf %252, %251 : vector<2x32xf32>
    %254 = arith.divf %252, %253 : vector<2x32xf32>
    %255 = vector.extract_strided_slice %248 {offsets = [0, 32], sizes = [2, 32], strides = [1, 1]} : vector<2x128xf32> to vector<2x32xf32>
    %256 = arith.negf %255 : vector<2x32xf32>
    %257 = math.exp %256 : vector<2x32xf32>
    %cst_80 = arith.constant 1.000000e+00 : f32
    %258 = vector.broadcast %cst_80 : f32 to vector<2x32xf32>
    %259 = arith.addf %258, %257 : vector<2x32xf32>
    %260 = arith.divf %258, %259 : vector<2x32xf32>
    %261 = vector.extract_strided_slice %248 {offsets = [0, 64], sizes = [2, 32], strides = [1, 1]} : vector<2x128xf32> to vector<2x32xf32>
    %262 = math.tanh %261 : vector<2x32xf32>
    %263 = vector.extract_strided_slice %248 {offsets = [0, 96], sizes = [2, 32], strides = [1, 1]} : vector<2x128xf32> to vector<2x32xf32>
    %264 = arith.negf %263 : vector<2x32xf32>
    %265 = math.exp %264 : vector<2x32xf32>
    %cst_81 = arith.constant 1.000000e+00 : f32
    %266 = vector.broadcast %cst_81 : f32 to vector<2x32xf32>
    %267 = arith.addf %266, %265 : vector<2x32xf32>
    %268 = arith.divf %266, %267 : vector<2x32xf32>
    %269 = arith.mulf %260, %237 : vector<2x32xf32>
    %270 = arith.mulf %254, %262 : vector<2x32xf32>
    %271 = arith.addf %269, %270 : vector<2x32xf32>
    %272 = math.tanh %271 : vector<2x32xf32>
    %273 = arith.mulf %268, %272 : vector<2x32xf32>
    %274 = vector.shape_cast %273 : vector<2x32xf32> to vector<2x1x32xf32>
    %c0_82 = arith.constant 0 : index
    %275 = arith.index_cast %c7_i32 : i32 to index
    %c0_83 = arith.constant 0 : index
    %276 = vector.load %arg4[%c0_82, %275, %c0_83] : memref<2x8x32xf32, #tpu.memory_space<vmem>>, vector<2x1x32xf32>
    tpu.vector_store %arg4[%c0_82, %275, %c0_83], %274 {strides = array<i32>} : memref<2x8x32xf32, #tpu.memory_space<vmem>>, vector<2x1x32xf32>,
    %c8_i32 = arith.constant 8 : i32
    %c0_84 = arith.constant 0 : index
    %c0_85 = arith.constant 0 : index
    %277 = vector.load %arg6[%c0_84, %c0_85] : memref<2x32xf32, #tpu.memory_space<vmem>>, vector<2x32xf32>
    tpu.vector_store %arg6[%c0_84, %c0_85], %273 {strides = array<i32>} : memref<2x32xf32, #tpu.memory_space<vmem>>, vector<2x32xf32>,
    %c0_86 = arith.constant 0 : index
    %c0_87 = arith.constant 0 : index
    %278 = vector.load %arg7[%c0_86, %c0_87] : memref<2x32xf32, #tpu.memory_space<vmem>>, vector<2x32xf32>
    tpu.vector_store %arg7[%c0_86, %c0_87], %271 {strides = array<i32>} : memref<2x32xf32, #tpu.memory_space<vmem>>, vector<2x32xf32>,
    %c0_i32_88 = arith.constant 0 : i32
    %279 = arith.cmpi eq, %arg1, %c0_i32_88 : i32
    %280 = arith.extui %279 : i1 to i32
    %c0_i32_89 = arith.constant 0 : i32
    %281 = arith.cmpi ne, %280, %c0_i32_89 : i32
    scf.if %281 {
      %c0_90 = arith.constant 0 : index
      %c0_91 = arith.constant 0 : index
      %282 = vector.load %arg5[%c0_90, %c0_91] : memref<2x32xf32, #tpu.memory_space<vmem>>, vector<2x32xf32>
      tpu.vector_store %arg5[%c0_90, %c0_91], %271 {strides = array<i32>} : memref<2x32xf32, #tpu.memory_space<vmem>>, vector<2x32xf32>,
    } else {
    }
    return
  }
  func.func @transform_0(%arg0: i32, %arg1: i32) -> (i32, i32, i32) {
    %c0_i32 = arith.constant 0 : i32
    %c0_i32_0 = arith.constant 0 : i32
    return %arg0, %arg1, %c0_i32 : i32, i32, i32
  }
  func.func @transform_1(%arg0: i32, %arg1: i32) -> (i32, i32) {
    %c0_i32 = arith.constant 0 : i32
    %c0_i32_0 = arith.constant 0 : i32
    %c0_i32_1 = arith.constant 0 : i32
    return %c0_i32, %c0_i32_0 : i32, i32
  }
  func.func @transform_2(%arg0: i32, %arg1: i32) -> (i32, i32, i32) {
    %c0_i32 = arith.constant 0 : i32
    %c0_i32_0 = arith.constant 0 : i32
    return %arg0, %arg1, %c0_i32 : i32, i32, i32
  }
  func.func @transform_3(%arg0: i32, %arg1: i32) -> (i32, i32) {
    %c0_i32 = arith.constant 0 : i32
    %c0_i32_0 = arith.constant 0 : i32
    return %arg0, %c0_i32 : i32, i32
  }
}

</mosaic_0001>

<bundles_post_ra>
// kernel: tpu_custom_call.1
= control target key start
LH: loop header
LB: loop body
LE: loop exit
PB: predicated region body
PF: predicated region fallthrough
CT: control target
= control target key end

     0   :  { %9 = vsyncpa [#allocation5], 0  ;;  %s2033_s0 = inlined_call_operand.hbm [shape: f32[2,8,128], index: 0, kind: input, shape index: {}]   ;;  %s2034_s1 = inlined_call_operand.hbm [shape: f32[32,128], index: 1, kind: input, shape index: {}]   ;;  %s2035_s2 = inlined_call_operand.hbm [shape: f32[2,8,32], index: 2, kind: output, shape index: {0}]   ;;  %s2036_s3 = inlined_call_operand.hbm [shape: f32[2,32], index: 3, kind: output, shape index: {1}]  }
   0x1   :  { %10 = vsyncpa [#allocation8], 0 }
   0x2   :  { %11 = vsyncpa [#allocation6], 0 }
   0x3   :  { %12 = vsyncpa [#allocation11], 0  ;;  %s1715_s12 = smov [#allocation4]   ;;  %s1619_s16 = scalar_lea.hbm %s2033_s0, 256 }
   0x4   :  { %s18_s13 = sshll.u32 %s1715_s12, 4  ;;  %p1620_p0 = scmp.ne.s32.totalorder %s2033_s0, %s1619_s16  ;;  %s19_s13 = int_to_ptr.vmem [resolvable:$true] %s18_s13 }
   0x5   :  { %p1623_p1 = scmp.lt.u32.totalorder %s1619_s16, %s2033_s0 }
   0x7   :  { %p1625_p2 = pnand %p1623_p1, %p1620_p0 }
   0x9   :  { %1628 = shalt.err (!%p1625_p2)
}
   0xa   :  { %s1629_s21 = scalar_lea.vmem %s19_s13, 256  ;;  %p1634_p4 = scmp.lt.s32.totalorder %s19_s13, %s19_s13 }
   0xb   :  { %p1630_p3 = scmp.ne.s32.totalorder %s19_s13, %s1629_s21  ;;  %p1635_p5 = scmp.lt.s32.totalorder %s1629_s21, %s1629_s21 }
   0xd   :  { %p1636_p6 = por %p1635_p5, %p1634_p4 }
   0xf   :  { %p1637_p7 = pnand %p1636_p6, %p1630_p3 }
  0x11   :  { %1640 = shalt.err (!%p1637_p7)
}
  0x12   :  { %s1716_s22 = smov 128   ;;  %s1717_s23 = smov 8  }
  0x13   :  { %24 = dma.hbm_to_vmem [thread:$0]  %s2033_s0, 256, %s19_s13, [#allocation5], %s1716_s22, %s1716_s22, %s1717_s23  }
  0x14   :  { %s1718_s26 = smov [#allocation7]   ;;  %s1641_s30 = scalar_lea.hbm %s2034_s1, 512 }
  0x15   :  { %s30_s27 = sshll.u32 %s1718_s26, 4  ;;  %p1642_p8 = scmp.ne.s32.totalorder %s2034_s1, %s1641_s30  ;;  %s31_s27 = int_to_ptr.vmem [resolvable:$true] %s30_s27 }
  0x16   :  { %p1645_p9 = scmp.lt.u32.totalorder %s1641_s30, %s2034_s1 }
  0x18   :  { %p1647_p10 = pnand %p1645_p9, %p1642_p8 }
  0x1a   :  { %1650 = shalt.err (!%p1647_p10)
}
  0x1b   :  { %s1651_s8 = scalar_lea.vmem %s31_s27, 512  ;;  %p1656_p12 = scmp.lt.s32.totalorder %s31_s27, %s31_s27 }
  0x1c   :  { %p1652_p11 = scmp.ne.s32.totalorder %s31_s27, %s1651_s8  ;;  %p1657_p13 = scmp.lt.s32.totalorder %s1651_s8, %s1651_s8 }
  0x1e   :  { %p1658_p0 = por %p1657_p13, %p1656_p12 }
  0x20   :  { %p1659_p1 = pnand %p1658_p0, %p1652_p11 }
  0x22   :  { %1662 = shalt.err (!%p1659_p1)
}
  0x23   :  { %36 = dma.hbm_to_vmem [thread:$0]  %s2034_s1, 512, %s31_s27, [#allocation8], %s1716_s22, %s1716_s22, %s1717_s23  }
  0x24   :  { %1707 = dma.done.wait [#allocation5], 256  }
  0x25   :  { %1708 = vsyncadd [#allocation5], 4294967040 }
  0x26   :  { %1709 = dma.done.wait [#allocation8], 512  }
  0x27   :  { %1710 = vsyncadd [#allocation8], 4294966784  ;;  %vm47_vm0 = vcmask 254976   ;;  %v1719_v0 = vmov 0.0|0.0   ;;  %vm1720_vm1 = vmmov 0   ;;  %v1721_v1 = vmov 0.0  }
  0x28   :  { %1431 = vmatprep.subr.bf16.mxu0 %v1719_v0  ;;  %1351 = vmatprep.mubr.msk.f32.mxu0 %vm1720_vm1, %v1721_v1  ;;  %48 = vst.msk [vmem:[#allocation2] sm:$0x3] %vm47_vm0, %v1721_v1  ;;  %49 = vst.msk [vmem:[#allocation3] sm:$0x3] %vm47_vm0, %v1721_v1  ;;  %v54_v2 = vld [vmem:[#allocation7] sm:$0xff]  ;;  %v55_v3 = vld [vmem:[#allocation7 + $0x8] sm:$0xff] }
  0x29   :  { %1437 = vmatprep.subr.bf16.mxu1 %v1719_v0  ;;  %1362 = vmatprep.mubr.msk.f32.mxu1 %vm1720_vm1, %v1721_v1  ;;  %v56_v4 = vld [vmem:[#allocation7 + $0x10] sm:$0xff]  ;;  %v1787_v5 = vpack.c.bf16 %v55_v3, %v54_v2  ;;  %v57_v6 = vld [vmem:[#allocation7 + $0x18] sm:$0xff]  ;;  %s1722_s1 = smov 32   ;;  %vm58_vm2 = vcmask 261120   ;;  %s1723_s10 = smov 64   ;;  %vm212_vm3 = vcmask 1041409  }
  0x2a   :  { %v1790_v9 = vpack.c.bf16 %v57_v6, %v56_v4  ;;  %v53_v11 = vld [vmem:[#allocation4 + $0x8] sm:$0x1]  ;;  %v52_v15 = vld [vmem:[#allocation4] sm:$0x1]  ;;  %v205_v49 = vld [vmem:[#allocation4 + $0x1] sm:$0x1] }
  0x2b   :  { %1433 = vmatpush3.bf16.msra.mxu0 %v1787_v5  ;;  %1439 = vmatpush3.bf16.msra.mxu1 %v1787_v5  ;;  %v206_v50 = vld [vmem:[#allocation4 + $0x9] sm:$0x1]  ;;  %vm202_vm4 = vcmask 253952   ;;  %s1724_s11 = smov 96   ;;  %s1725_s12 = smov [#allocation9]  }
  0x2c   :  { %1434 = vmatprep.subr.bf16.mxu0 %v1719_v0  ;;  %1440 = vmatprep.subr.bf16.mxu1 %v1719_v0  ;;  %s1252_s13 = sshll.u32 %s1725_s12, 4  ;;  %s1726_s14 = smov [#allocation10]   ;;  %s1253_s13 = int_to_ptr.vmem [resolvable:$true] %s1252_s13 }
  0x2d   :  { %s1265_s15 = sshll.u32 %s1726_s14, 4  ;;  %s1663_s16 = scalar_lea.vmem %s1253_s13, 256  ;;  %s1995_s15 = int_to_ptr.vmem [resolvable:$true] %s1265_s15 }
  0x2e   :  { %p1664_p2 = scmp.ne.s32.totalorder %s1253_s13, %s1663_s16  ;;  %p1668_p3 = scmp.lt.s32.totalorder %s1253_s13, %s1253_s13 }
  0x2f   :  { %v51_v7 = vld [vmem:[#allocation3] sm:$0x3]  ;;  %1436 = vmatpush3.bf16.msra.mxu0 %v1790_v9  ;;  %v50_v10 = vld [vmem:[#allocation2] sm:$0x3]  ;;  %1442 = vmatpush3.bf16.msra.mxu1 %v1790_v9  ;;  %p1669_p4 = scmp.lt.s32.totalorder %s1663_s16, %s1663_s16 }
  0x30   :  { %v153_v8 = vrot.slane %v51_v7, 1  ;;  %1443 = vmatprep.subr.bf16.mxu0 %v1719_v0  ;;  %1449 = vmatprep.subr.bf16.mxu1 %v1719_v0 }
  0x31   :  { %p1670_p5 = por %p1669_p4, %p1668_p3 }
  0x32   :  { %156 = vrot.lane.b32.xlu1 %v153_v8, %s1722_s1  ;;  %1352 = vmatmul.mubr.msk.f32.vlgmr.msra.gmra.mrb[0].mxu0 %vm58_vm2, %v50_v10 }
  0x33   :  { %1445 = vmatpush3.bf16.msra.mxu0 %v1787_v5  ;;  %1373 = vmatprep.mubr.msk.f32.mxu0 %vm1720_vm1, %v1721_v1  ;;  %p1671_p6 = pnand %p1670_p5, %p1664_p2 }
  0x34   :  { %1446 = vmatprep.subr.bf16.mxu0 %v1719_v0 }
  0x36   :  { %154 = vrot.lane.b32.xlu1 %v51_v7, %s1722_s1 }
  0x37   :  { %1448 = vmatpush3.bf16.msra.mxu0 %v1790_v9 }
  0x38   :  { %1455 = vmatprep.subr.bf16.mxu0 %v1719_v0 }
  0xa4   :  { %v157_v32 = vpop.permute.xlu1 %156 }
  0xa8   :  { %v155_v34 = vpop.permute.xlu1 %154 }
 0x105   :  { %v128_v12 = vpop.f32.mrb[0].mxu0 }
 0x106   :  { %v133_v13 = vrot.slane %v128_v12, 1  ;;  %v1353_v14 = vpop.f32.mrb[1].mxu0  ;;  %v136_v17 = vadd.f32 %v128_v12, %v52_v15 }
 0x108   :  { %v137_v16 = vadd.f32 %v133_v13, %v53_v11  ;;  %v1280_v21 = vmul.f32 -1.442695, %v136_v17 }
 0x10a   :  { %1491 = vtanh.f32 %v137_v16  ;;  %v1281_v20 = vmul.f32 -1.442695, %v137_v16 }
 0x10b   :  { %1493 = vtanh.f32 %v136_v17 }
 0x10c   :  { %1495 = vpow2.f32 %v1281_v20 }
 0x10d   :  { %1497 = vpow2.f32 %v1280_v21 }
 0x114   :  { %v1492_v18 = vpop.eup %1491 }
 0x115   :  { %166 = vrot.lane.b32.xlu0 %v1492_v18, %s1723_s10  ;;  %v1494_v19 = vpop.eup %1493 }
 0x116   :  { %v1496_v22 = vpop.eup %1495 }
 0x117   :  { %v145_v23 = vadd.f32 1.0, %v1496_v22  ;;  %v1498_v24 = vpop.eup %1497 }
 0x118   :  { %v144_v25 = vadd.f32 1.0, %v1498_v24 }
 0x119   :  { %164 = vrot.lane.b32.xlu0 %v1494_v19, %s1723_s10  ;;  %1499 = vrcp.f32 %v145_v23 }
 0x11a   :  { %1501 = vrcp.f32 %v144_v25  ;;  %v352_v25 = vld [vmem:[#allocation4 + $0x2] sm:$0x1] }
 0x123   :  { %v1500_v26 = vpop.eup %1499 }
 0x124   :  { %v1502_v29 = vpop.eup %1501  ;;  %v161_v33 = vmul.f32 %v1500_v26, %v157_v32 }
 0x125   :  { %v160_v37 = vmul.f32 %v1502_v29, %v155_v34 }
 0x187   :  { %v167_v27 = vpop.permute.xlu0 %166 }
 0x188   :  { %v171_v28 = vmul.f32 %v1500_v26, %v167_v27 }
 0x18a   :  { %176 = vrot.lane.b32.xlu0 %v171_v28, %s1722_s1 }
 0x18b   :  { %v165_v30 = vpop.permute.xlu0 %164 }
 0x18c   :  { %v170_v31 = vmul.f32 %v1502_v29, %v165_v30 }
 0x18e   :  { %174 = vrot.lane.b32.xlu1 %v170_v31, %s1722_s1 }
 0x1fc   :  { %v177_v35 = vpop.permute.xlu0 %176 }
 0x1fd   :  { %v181_v36 = vadd.f32 %v177_v35, %v161_v33 }
 0x1ff   :  { %1503 = vtanh.f32 %v181_v36 }
 0x200   :  { %v175_v38 = vpop.permute.xlu1 %174 }
 0x201   :  { %v180_v39 = vadd.f32 %v175_v38, %v160_v37 }
 0x203   :  { %1505 = vtanh.f32 %v180_v39 }
 0x209   :  { %v1504_v40 = vpop.eup %1503 }
 0x20a   :  { %188 = vrot.lane.b32.xlu0 %v1504_v40, %s1723_s10 }
 0x20d   :  { %v1506_v41 = vpop.eup %1505 }
 0x20e   :  { %186 = vrot.lane.b32.xlu1 %v1506_v41, %s1723_s10 }
 0x27c   :  { %v189_v42 = vpop.permute.xlu0 %188 }
 0x27d   :  { %v1814_v43 = vmul.f32 %v1500_v26, %v189_v42  ;;  %v353_v26 = vld [vmem:[#allocation4 + $0xa] sm:$0x1] }
 0x27f   :  { %v211_v45 = vrot.slane %v1814_v43, 7 }
 0x280   :  { %v187_v44 = vpop.permute.xlu1 %186 }
 0x281   :  { %v1817_v46 = vmul.f32 %v1502_v29, %v187_v44 }
 0x283   :  { %v213_v47 = vsel %vm212_vm3, %v211_v45, %v1817_v46 }
 0x284   :  { %214 = vrot.lane.b32.xlu0 %v213_v47, %s1722_s1 }
 0x2f6   :  { %v215_v48 = vpop.permute.xlu0 %214 }
 0x2f7   :  { %1363 = vmatmul.mubr.msk.f32.vlgmr.msra.gmra.mrb[0].mxu1 %vm58_vm2, %v215_v48 }
 0x2f8   :  { %1451 = vmatpush3.bf16.msra.mxu1 %v1787_v5  ;;  %1384 = vmatprep.mubr.msk.f32.mxu1 %vm1720_vm1, %v1721_v1 }
 0x2f9   :  { %1452 = vmatprep.subr.bf16.mxu1 %v1719_v0 }
 0x2fc   :  { %1454 = vmatpush3.bf16.msra.mxu1 %v1790_v9 }
 0x2fd   :  { %1461 = vmatprep.subr.bf16.mxu1 %v1719_v0 }
 0x3ca   :  { %v284_v51 = vpop.f32.mrb[0].mxu1 }
 0x3cb   :  { %v289_v52 = vrot.slane %v284_v51, 1  ;;  %v292_v53 = vadd.f32 %v284_v51, %v205_v49  ;;  %v1364_v54 = vpop.f32.mrb[1].mxu1 }
 0x3cd   :  { %v293_v55 = vadd.f32 %v289_v52, %v206_v50  ;;  %1507 = vtanh.f32 %v292_v53  ;;  %v1283_v58 = vmul.f32 -1.442695, %v292_v53 }
 0x3cf   :  { %1509 = vtanh.f32 %v293_v55  ;;  %v1284_v59 = vmul.f32 -1.442695, %v293_v55 }
 0x3d0   :  { %1511 = vpow2.f32 %v1283_v58 }
 0x3d1   :  { %1513 = vpow2.f32 %v1284_v59 }
 0x3d7   :  { %v1508_v56 = vpop.eup %1507 }
 0x3d8   :  { %312 = vrot.lane.b32.xlu0 %v1508_v56, %s1723_s10 }
 0x3d9   :  { %v1510_v57 = vpop.eup %1509 }
 0x3da   :  { %314 = vrot.lane.b32.xlu1 %v1510_v57, %s1723_s10  ;;  %v1512_v60 = vpop.eup %1511 }
 0x3db   :  { %v1514_v61 = vpop.eup %1513  ;;  %v300_v62 = vadd.f32 1.0, %v1512_v60 }
 0x3dc   :  { %v301_v63 = vadd.f32 1.0, %v1514_v61 }
 0x3dd   :  { %1515 = vrcp.f32 %v300_v62 }
 0x3de   :  { %1517 = vrcp.f32 %v301_v63  ;;  %v498_v63 = vld [vmem:[#allocation4 + $0x3] sm:$0x1] }
 0x3e7   :  { %v1516_v2 = vpop.eup %1515 }
 0x3e8   :  { %v1518_v6 = vpop.eup %1517  ;;  %v308_v10 = vmul.f32 %v1516_v2, %v180_v39 }
 0x3e9   :  { %v309_v13 = vmul.f32 %v1518_v6, %v181_v36 }
 0x44a   :  { %v313_v3 = vpop.permute.xlu0 %312 }
 0x44b   :  { %v318_v4 = vmul.f32 %v1516_v2, %v313_v3 }
 0x44c   :  { %v315_v7 = vpop.permute.xlu1 %314 }
 0x44d   :  { %322 = vrot.lane.b32.xlu0 %v318_v4, %s1722_s1  ;;  %v319_v8 = vmul.f32 %v1518_v6, %v315_v7 }
 0x44f   :  { %324 = vrot.lane.b32.xlu1 %v319_v8, %s1722_s1 }
 0x4bf   :  { %v323_v11 = vpop.permute.xlu0 %322 }
 0x4c0   :  { %v328_v12 = vadd.f32 %v323_v11, %v308_v10 }
 0x4c1   :  { %v325_v14 = vpop.permute.xlu1 %324 }
 0x4c2   :  { %1519 = vtanh.f32 %v328_v12  ;;  %v329_v15 = vadd.f32 %v325_v14, %v309_v13 }
 0x4c4   :  { %1521 = vtanh.f32 %v329_v15 }
 0x4cc   :  { %v1520_v16 = vpop.eup %1519 }
 0x4cd   :  { %334 = vrot.lane.b32.xlu0 %v1520_v16, %s1723_s10 }
 0x4ce   :  { %v1522_v17 = vpop.eup %1521 }
 0x4cf   :  { %336 = vrot.lane.b32.xlu1 %v1522_v17, %s1723_s10 }
 0x53f   :  { %v335_v18 = vpop.permute.xlu0 %334 }
 0x540   :  { %v1837_v21 = vmul.f32 %v1516_v2, %v335_v18  ;;  %v499_v2 = vld [vmem:[#allocation4 + $0xb] sm:$0x1] }
 0x541   :  { %v337_v19 = vpop.permute.xlu1 %336 }
 0x542   :  { %v1835_v20 = vmul.f32 %v1518_v6, %v337_v19 }
 0x544   :  { %v358_v22 = vrot.slane %v1835_v20, 7 }
 0x546   :  { %v359_v23 = vsel %vm212_vm3, %v358_v22, %v1837_v21 }
 0x547   :  { %360 = vrot.lane.b32.xlu1 %v359_v23, %s1722_s1 }
 0x5b9   :  { %v361_v24 = vpop.permute.xlu1 %360 }
 0x5ba   :  { %1374 = vmatmul.mubr.msk.f32.vlgmr.msra.gmra.mrb[2].mxu0 %vm58_vm2, %v361_v24 }
 0x5bb   :  { %1457 = vmatpush3.bf16.msra.mxu0 %v1787_v5  ;;  %1395 = vmatprep.mubr.msk.f32.mxu0 %vm1720_vm1, %v1721_v1 }
 0x5bc   :  { %1458 = vmatprep.subr.bf16.mxu0 %v1719_v0 }
 0x5bf   :  { %1460 = vmatpush3.bf16.msra.mxu0 %v1790_v9 }
 0x5c0   :  { %1467 = vmatprep.subr.bf16.mxu0 %v1719_v0 }
 0x68d   :  { %v430_v27 = vpop.f32.mrb[2].mxu0 }
 0x68e   :  { %v435_v28 = vrot.slane %v430_v27, 1  ;;  %v438_v29 = vadd.f32 %v430_v27, %v352_v25  ;;  %v1375_v30 = vpop.f32.mrb[3].mxu0 }
 0x690   :  { %v439_v31 = vadd.f32 %v435_v28, %v353_v26  ;;  %1523 = vtanh.f32 %v438_v29  ;;  %v1286_v34 = vmul.f32 -1.442695, %v438_v29 }
 0x692   :  { %1525 = vtanh.f32 %v439_v31  ;;  %v1287_v35 = vmul.f32 -1.442695, %v439_v31 }
 0x693   :  { %1527 = vpow2.f32 %v1286_v34 }
 0x694   :  { %1529 = vpow2.f32 %v1287_v35 }
 0x69a   :  { %v1524_v32 = vpop.eup %1523 }
 0x69b   :  { %458 = vrot.lane.b32.xlu1 %v1524_v32, %s1723_s10 }
 0x69c   :  { %v1526_v33 = vpop.eup %1525 }
 0x69d   :  { %460 = vrot.lane.b32.xlu0 %v1526_v33, %s1723_s10  ;;  %v1528_v36 = vpop.eup %1527 }
 0x69e   :  { %v1530_v37 = vpop.eup %1529  ;;  %v446_v38 = vadd.f32 1.0, %v1528_v36 }
 0x69f   :  { %v447_v39 = vadd.f32 1.0, %v1530_v37 }
 0x6a0   :  { %1531 = vrcp.f32 %v446_v38 }
 0x6a1   :  { %1533 = vrcp.f32 %v447_v39 }
 0x6aa   :  { %v1532_v40 = vpop.eup %1531 }
 0x6ab   :  { %v1534_v44 = vpop.eup %1533  ;;  %v454_v48 = vmul.f32 %v1532_v40, %v328_v12 }
 0x6ac   :  { %v455_v51 = vmul.f32 %v1534_v44, %v329_v15 }
 0x70d   :  { %v459_v41 = vpop.permute.xlu1 %458 }
 0x70e   :  { %v464_v42 = vmul.f32 %v1532_v40, %v459_v41  ;;  %v644_v41 = vld [vmem:[#allocation4 + $0x4] sm:$0x1] }
 0x70f   :  { %v461_v45 = vpop.permute.xlu0 %460 }
 0x710   :  { %468 = vrot.lane.b32.xlu1 %v464_v42, %s1722_s1  ;;  %v465_v47 = vmul.f32 %v1534_v44, %v461_v45  ;;  %v645_v42 = vld [vmem:[#allocation4 + $0xc] sm:$0x1] }
 0x712   :  { %470 = vrot.lane.b32.xlu0 %v465_v47, %s1722_s1 }
 0x782   :  { %v469_v49 = vpop.permute.xlu1 %468 }
 0x783   :  { %v474_v50 = vadd.f32 %v469_v49, %v454_v48 }
 0x784   :  { %v471_v52 = vpop.permute.xlu0 %470 }
 0x785   :  { %1535 = vtanh.f32 %v474_v50  ;;  %v475_v53 = vadd.f32 %v471_v52, %v455_v51 }
 0x787   :  { %1537 = vtanh.f32 %v475_v53 }
 0x78f   :  { %v1536_v54 = vpop.eup %1535 }
 0x790   :  { %480 = vrot.lane.b32.xlu1 %v1536_v54, %s1723_s10 }
 0x791   :  { %v1538_v55 = vpop.eup %1537 }
 0x792   :  { %482 = vrot.lane.b32.xlu0 %v1538_v55, %s1723_s10 }
 0x802   :  { %v481_v56 = vpop.permute.xlu1 %480 }
 0x803   :  { %v1858_v59 = vmul.f32 %v1532_v40, %v481_v56 }
 0x804   :  { %v483_v57 = vpop.permute.xlu0 %482 }
 0x805   :  { %v1856_v58 = vmul.f32 %v1534_v44, %v483_v57 }
 0x807   :  { %v504_v60 = vrot.slane %v1856_v58, 7 }
 0x809   :  { %v505_v61 = vsel %vm212_vm3, %v504_v60, %v1858_v59 }
 0x80a   :  { %506 = vrot.lane.b32.xlu0 %v505_v61, %s1722_s1 }
 0x87c   :  { %v507_v62 = vpop.permute.xlu0 %506 }
 0x87d   :  { %1385 = vmatmul.mubr.msk.f32.vlgmr.msra.gmra.mrb[2].mxu1 %vm58_vm2, %v507_v62 }
 0x87e   :  { %1463 = vmatpush3.bf16.msra.mxu1 %v1787_v5  ;;  %1406 = vmatprep.mubr.msk.f32.mxu1 %vm1720_vm1, %v1721_v1 }
 0x87f   :  { %1464 = vmatprep.subr.bf16.mxu1 %v1719_v0 }
 0x882   :  { %1466 = vmatpush3.bf16.msra.mxu1 %v1790_v9 }
 0x883   :  { %1473 = vmatprep.subr.bf16.mxu1 %v1719_v0 }
 0x950   :  { %v576_v3 = vpop.f32.mrb[2].mxu1 }
 0x951   :  { %v581_v4 = vrot.slane %v576_v3, 1  ;;  %v584_v6 = vadd.f32 %v576_v3, %v498_v63  ;;  %v1386_v7 = vpop.f32.mrb[3].mxu1 }
 0x953   :  { %v585_v8 = vadd.f32 %v581_v4, %v499_v2  ;;  %1539 = vtanh.f32 %v584_v6  ;;  %v1289_v12 = vmul.f32 -1.442695, %v584_v6 }
 0x955   :  { %1541 = vtanh.f32 %v585_v8  ;;  %v1290_v13 = vmul.f32 -1.442695, %v585_v8 }
 0x956   :  { %1543 = vpow2.f32 %v1289_v12 }
 0x957   :  { %1545 = vpow2.f32 %v1290_v13 }
 0x95d   :  { %v1540_v10 = vpop.eup %1539 }
 0x95e   :  { %604 = vrot.lane.b32.xlu0 %v1540_v10, %s1723_s10 }
 0x95f   :  { %v1542_v11 = vpop.eup %1541 }
 0x960   :  { %606 = vrot.lane.b32.xlu1 %v1542_v11, %s1723_s10  ;;  %v1544_v14 = vpop.eup %1543 }
 0x961   :  { %v1546_v15 = vpop.eup %1545  ;;  %v592_v16 = vadd.f32 1.0, %v1544_v14 }
 0x962   :  { %v593_v17 = vadd.f32 1.0, %v1546_v15 }
 0x963   :  { %1547 = vrcp.f32 %v592_v16 }
 0x964   :  { %1549 = vrcp.f32 %v593_v17 }
 0x96d   :  { %v1548_v18 = vpop.eup %1547 }
 0x96e   :  { %v1550_v23 = vpop.eup %1549  ;;  %v600_v26 = vmul.f32 %v1548_v18, %v474_v50 }
 0x96f   :  { %v601_v29 = vmul.f32 %v1550_v23, %v475_v53 }
 0x9d0   :  { %v605_v19 = vpop.permute.xlu0 %604 }
 0x9d1   :  { %v610_v22 = vmul.f32 %v1548_v18, %v605_v19 }
 0x9d2   :  { %v607_v24 = vpop.permute.xlu1 %606 }
 0x9d3   :  { %614 = vrot.lane.b32.xlu0 %v610_v22, %s1722_s1  ;;  %v611_v25 = vmul.f32 %v1550_v23, %v607_v24  ;;  %v791_v24 = vld [vmem:[#allocation4 + $0xd] sm:$0x1] }
 0x9d5   :  { %616 = vrot.lane.b32.xlu1 %v611_v25, %s1722_s1 }
 0xa45   :  { %v615_v27 = vpop.permute.xlu0 %614 }
 0xa46   :  { %v620_v28 = vadd.f32 %v615_v27, %v600_v26 }
 0xa47   :  { %v617_v30 = vpop.permute.xlu1 %616 }
 0xa48   :  { %1551 = vtanh.f32 %v620_v28  ;;  %v621_v31 = vadd.f32 %v617_v30, %v601_v29 }
 0xa4a   :  { %1553 = vtanh.f32 %v621_v31 }
 0xa52   :  { %v1552_v32 = vpop.eup %1551 }
 0xa53   :  { %626 = vrot.lane.b32.xlu0 %v1552_v32, %s1723_s10 }
 0xa54   :  { %v1554_v33 = vpop.eup %1553 }
 0xa55   :  { %628 = vrot.lane.b32.xlu1 %v1554_v33, %s1723_s10 }
 0xac5   :  { %v627_v34 = vpop.permute.xlu0 %626 }
 0xac6   :  { %v1879_v37 = vmul.f32 %v1548_v18, %v627_v34 }
 0xac7   :  { %v629_v35 = vpop.permute.xlu1 %628 }
 0xac8   :  { %v1877_v36 = vmul.f32 %v1550_v23, %v629_v35  ;;  %v790_v23 = vld [vmem:[#allocation4 + $0x5] sm:$0x1] }
 0xaca   :  { %v650_v38 = vrot.slane %v1877_v36, 7 }
 0xacc   :  { %v651_v39 = vsel %vm212_vm3, %v650_v38, %v1879_v37 }
 0xacd   :  { %652 = vrot.lane.b32.xlu1 %v651_v39, %s1722_s1 }
 0xb3f   :  { %v653_v40 = vpop.permute.xlu1 %652 }
 0xb40   :  { %1396 = vmatmul.mubr.msk.f32.vlgmr.msra.gmra.mrb[4].mxu0 %vm58_vm2, %v653_v40 }
 0xb41   :  { %1469 = vmatpush3.bf16.msra.mxu0 %v1787_v5  ;;  %1417 = vmatprep.mubr.msk.f32.mxu0 %vm1720_vm1, %v1721_v1 }
 0xb42   :  { %1470 = vmatprep.subr.bf16.mxu0 %v1719_v0 }
 0xb45   :  { %1472 = vmatpush3.bf16.msra.mxu0 %v1790_v9 }
 0xc13   :  { %v722_v44 = vpop.f32.mrb[4].mxu0 }
 0xc14   :  { %v727_v45 = vrot.slane %v722_v44, 1  ;;  %v730_v47 = vadd.f32 %v722_v44, %v644_v41  ;;  %v1397_v48 = vpop.f32.mrb[5].mxu0 }
 0xc16   :  { %v731_v49 = vadd.f32 %v727_v45, %v645_v42  ;;  %1555 = vtanh.f32 %v730_v47  ;;  %v1292_v52 = vmul.f32 -1.442695, %v730_v47 }
 0xc18   :  { %1557 = vtanh.f32 %v731_v49  ;;  %v1293_v53 = vmul.f32 -1.442695, %v731_v49 }
 0xc19   :  { %1559 = vpow2.f32 %v1292_v52 }
 0xc1a   :  { %1561 = vpow2.f32 %v1293_v53 }
 0xc20   :  { %v1556_v50 = vpop.eup %1555 }
 0xc21   :  { %750 = vrot.lane.b32.xlu1 %v1556_v50, %s1723_s10 }
 0xc22   :  { %v1558_v51 = vpop.eup %1557 }
 0xc23   :  { %752 = vrot.lane.b32.xlu0 %v1558_v51, %s1723_s10  ;;  %v1560_v54 = vpop.eup %1559 }
 0xc24   :  { %v1562_v55 = vpop.eup %1561  ;;  %v738_v56 = vadd.f32 1.0, %v1560_v54 }
 0xc25   :  { %v739_v57 = vadd.f32 1.0, %v1562_v55 }
 0xc26   :  { %1563 = vrcp.f32 %v738_v56 }
 0xc27   :  { %1565 = vrcp.f32 %v739_v57 }
 0xc30   :  { %v1564_v60 = vpop.eup %1563 }
 0xc31   :  { %v1566_v63 = vpop.eup %1565  ;;  %v746_v4 = vmul.f32 %v1564_v60, %v620_v28 }
 0xc32   :  { %v747_v8 = vmul.f32 %v1566_v63, %v621_v31 }
 0xc93   :  { %v751_v61 = vpop.permute.xlu1 %750 }
 0xc94   :  { %v756_v62 = vmul.f32 %v1564_v60, %v751_v61  ;;  %v936_v61 = vld [vmem:[#allocation4 + $0x6] sm:$0x1] }
 0xc95   :  { %v753_v2 = vpop.permute.xlu0 %752 }
 0xc96   :  { %760 = vrot.lane.b32.xlu1 %v756_v62, %s1722_s1  ;;  %v757_v3 = vmul.f32 %v1566_v63, %v753_v2  ;;  %v937_v62 = vld [vmem:[#allocation4 + $0xe] sm:$0x1] }
 0xc98   :  { %762 = vrot.lane.b32.xlu0 %v757_v3, %s1722_s1 }
 0xd08   :  { %v761_v6 = vpop.permute.xlu1 %760 }
 0xd09   :  { %v766_v7 = vadd.f32 %v761_v6, %v746_v4 }
 0xd0a   :  { %v763_v10 = vpop.permute.xlu0 %762 }
 0xd0b   :  { %1567 = vtanh.f32 %v766_v7  ;;  %v767_v11 = vadd.f32 %v763_v10, %v747_v8 }
 0xd0d   :  { %1569 = vtanh.f32 %v767_v11 }
 0xd15   :  { %v1568_v12 = vpop.eup %1567 }
 0xd16   :  { %772 = vrot.lane.b32.xlu1 %v1568_v12, %s1723_s10 }
 0xd17   :  { %v1570_v13 = vpop.eup %1569 }
 0xd18   :  { %774 = vrot.lane.b32.xlu0 %v1570_v13, %s1723_s10 }
 0xd88   :  { %v773_v14 = vpop.permute.xlu1 %772 }
 0xd89   :  { %v1899_v17 = vmul.f32 %v1564_v60, %v773_v14 }
 0xd8a   :  { %v775_v15 = vpop.permute.xlu0 %774 }
 0xd8b   :  { %v1897_v16 = vmul.f32 %v1566_v63, %v775_v15 }
 0xd8d   :  { %v796_v18 = vrot.slane %v1897_v16, 7 }
 0xd8f   :  { %v797_v19 = vsel %vm212_vm3, %v796_v18, %v1899_v17 }
 0xd90   :  { %798 = vrot.lane.b32.xlu0 %v797_v19, %s1722_s1 }
 0xe02   :  { %v799_v22 = vpop.permute.xlu0 %798 }
 0xe03   :  { %1407 = vmatmul.mubr.msk.f32.vlgmr.msra.gmra.mrb[4].mxu1 %vm58_vm2, %v799_v22 }
 0xe04   :  { %1475 = vmatpush3.bf16.msra.mxu1 %v1787_v5  ;;  %1428 = vmatprep.mubr.msk.f32.mxu1 %vm1720_vm1, %v1721_v1 }
 0xe05   :  { %1476 = vmatprep.subr.bf16.mxu1 %v1719_v0 }
 0xe08   :  { %1478 = vmatpush3.bf16.msra.mxu1 %v1790_v9 }
 0xed6   :  { %v868_v25 = vpop.f32.mrb[4].mxu1 }
 0xed7   :  { %v873_v26 = vrot.slane %v868_v25, 1  ;;  %v876_v27 = vadd.f32 %v868_v25, %v790_v23  ;;  %v1408_v28 = vpop.f32.mrb[5].mxu1 }
 0xed9   :  { %v877_v29 = vadd.f32 %v873_v26, %v791_v24  ;;  %1571 = vtanh.f32 %v876_v27  ;;  %v1295_v1 = vmul.f32 -1.442695, %v876_v27 }
 0xedb   :  { %1573 = vtanh.f32 %v877_v29  ;;  %v1296_v31 = vmul.f32 -1.442695, %v877_v29 }
 0xedc   :  { %1575 = vpow2.f32 %v1295_v1 }
 0xedd   :  { %1577 = vpow2.f32 %v1296_v31 }
 0xee3   :  { %v1572_v30 = vpop.eup %1571 }
 0xee4   :  { %896 = vrot.lane.b32.xlu0 %v1572_v30, %s1723_s10 }
 0xee5   :  { %v1574_v5 = vpop.eup %1573 }
 0xee6   :  { %898 = vrot.lane.b32.xlu1 %v1574_v5, %s1723_s10  ;;  %v1576_v0 = vpop.eup %1575 }
 0xee7   :  { %v1578_v9 = vpop.eup %1577  ;;  %v884_v32 = vadd.f32 1.0, %v1576_v0 }
 0xee8   :  { %v885_v33 = vadd.f32 1.0, %v1578_v9 }
 0xee9   :  { %1579 = vrcp.f32 %v884_v32 }
 0xeea   :  { %1581 = vrcp.f32 %v885_v33 }
 0xef3   :  { %v1580_v34 = vpop.eup %1579 }
 0xef4   :  { %v1582_v39 = vpop.eup %1581  ;;  %v892_v42 = vmul.f32 %v1580_v34, %v766_v7 }
 0xef5   :  { %v893_v47 = vmul.f32 %v1582_v39, %v767_v11 }
 0xf56   :  { %v897_v35 = vpop.permute.xlu0 %896 }
 0xf57   :  { %v902_v38 = vmul.f32 %v1580_v34, %v897_v35 }
 0xf58   :  { %v899_v40 = vpop.permute.xlu1 %898 }
 0xf59   :  { %906 = vrot.lane.b32.xlu0 %v902_v38, %s1722_s1  ;;  %v903_v41 = vmul.f32 %v1582_v39, %v899_v40  ;;  %v1083_v40 = vld [vmem:[#allocation4 + $0xf] sm:$0x1] }
 0xf5b   :  { %908 = vrot.lane.b32.xlu1 %v903_v41, %s1722_s1 }
 0xfcb   :  { %v907_v44 = vpop.permute.xlu0 %906 }
 0xfcc   :  { %v912_v45 = vadd.f32 %v907_v44, %v892_v42 }
 0xfcd   :  { %v909_v48 = vpop.permute.xlu1 %908 }
 0xfce   :  { %1583 = vtanh.f32 %v912_v45  ;;  %v913_v49 = vadd.f32 %v909_v48, %v893_v47 }
 0xfd0   :  { %1585 = vtanh.f32 %v913_v49 }
 0xfd8   :  { %v1584_v50 = vpop.eup %1583 }
 0xfd9   :  { %918 = vrot.lane.b32.xlu0 %v1584_v50, %s1723_s10 }
 0xfda   :  { %v1586_v51 = vpop.eup %1585 }
 0xfdb   :  { %920 = vrot.lane.b32.xlu1 %v1586_v51, %s1723_s10 }
0x104b   :  { %v919_v52 = vpop.permute.xlu0 %918 }
0x104c   :  { %v1919_v55 = vmul.f32 %v1580_v34, %v919_v52 }
0x104d   :  { %v921_v53 = vpop.permute.xlu1 %920 }
0x104e   :  { %v1917_v54 = vmul.f32 %v1582_v39, %v921_v53  ;;  %v1082_v39 = vld [vmem:[#allocation4 + $0x7] sm:$0x1] }
0x1050   :  { %v942_v56 = vrot.slane %v1917_v54, 7 }
0x1052   :  { %v943_v57 = vsel %vm212_vm3, %v942_v56, %v1919_v55 }
0x1053   :  { %944 = vrot.lane.b32.xlu1 %v943_v57, %s1722_s1 }
0x10c5   :  { %v945_v60 = vpop.permute.xlu1 %944 }
0x10c6   :  { %1418 = vmatmul.mubr.msk.f32.vlgmr.msra.gmra.mrb[6].mxu0 %vm58_vm2, %v945_v60 }
0x1199   :  { %v1014_v63 = vpop.f32.mrb[6].mxu0 }
0x119a   :  { %v1019_v2 = vrot.slane %v1014_v63, 1  ;;  %v1022_v3 = vadd.f32 %v1014_v63, %v936_v61  ;;  %v1419_v4 = vpop.f32.mrb[7].mxu0 }
0x119c   :  { %v1023_v6 = vadd.f32 %v1019_v2, %v937_v62  ;;  %1587 = vtanh.f32 %v1022_v3  ;;  %v1298_v10 = vmul.f32 -1.442695, %v1022_v3 }
0x119e   :  { %1589 = vtanh.f32 %v1023_v6  ;;  %v1299_v11 = vmul.f32 -1.442695, %v1023_v6 }
0x119f   :  { %1591 = vpow2.f32 %v1298_v10 }
0x11a0   :  { %1593 = vpow2.f32 %v1299_v11 }
0x11a6   :  { %v1588_v7 = vpop.eup %1587 }
0x11a7   :  { %1042 = vrot.lane.b32.xlu1 %v1588_v7, %s1723_s10 }
0x11a8   :  { %v1590_v8 = vpop.eup %1589 }
0x11a9   :  { %1044 = vrot.lane.b32.xlu0 %v1590_v8, %s1723_s10  ;;  %v1592_v12 = vpop.eup %1591 }
0x11aa   :  { %v1594_v13 = vpop.eup %1593  ;;  %v1030_v14 = vadd.f32 1.0, %v1592_v12 }
0x11ab   :  { %v1031_v15 = vadd.f32 1.0, %v1594_v13 }
0x11ac   :  { %1595 = vrcp.f32 %v1030_v14 }
0x11ad   :  { %1597 = vrcp.f32 %v1031_v15 }
0x11b6   :  { %v1596_v18 = vpop.eup %1595 }
0x11b7   :  { %v1598_v23 = vpop.eup %1597  ;;  %v1038_v26 = vmul.f32 %v1596_v18, %v912_v45 }
0x11b8   :  { %v1039_v29 = vmul.f32 %v1598_v23, %v913_v49 }
0x1219   :  { %v1043_v19 = vpop.permute.xlu1 %1042 }
0x121a   :  { %v1048_v22 = vmul.f32 %v1596_v18, %v1043_v19 }
0x121b   :  { %v1045_v24 = vpop.permute.xlu0 %1044 }
0x121c   :  { %1052 = vrot.lane.b32.xlu1 %v1048_v22, %s1722_s1  ;;  %v1049_v25 = vmul.f32 %v1598_v23, %v1045_v24 }
0x121e   :  { %1054 = vrot.lane.b32.xlu0 %v1049_v25, %s1722_s1 }
0x128e   :  { %v1053_v27 = vpop.permute.xlu1 %1052 }
0x128f   :  { %v1058_v28 = vadd.f32 %v1053_v27, %v1038_v26 }
0x1290   :  { %v1055_v30 = vpop.permute.xlu0 %1054 }
0x1291   :  { %1599 = vtanh.f32 %v1058_v28  ;;  %v1059_v5 = vadd.f32 %v1055_v30, %v1039_v29 }
0x1293   :  { %1601 = vtanh.f32 %v1059_v5 }
0x129b   :  { %v1600_v1 = vpop.eup %1599 }
0x129c   :  { %1064 = vrot.lane.b32.xlu1 %v1600_v1, %s1723_s10 }
0x129d   :  { %v1602_v31 = vpop.eup %1601 }
0x129e   :  { %1066 = vrot.lane.b32.xlu0 %v1602_v31, %s1723_s10 }
0x130e   :  { %v1065_v0 = vpop.permute.xlu1 %1064 }
0x130f   :  { %v1934_v33 = vmul.f32 %v1596_v18, %v1065_v0 }
0x1310   :  { %v1067_v9 = vpop.permute.xlu0 %1066 }
0x1311   :  { %v1932_v32 = vmul.f32 %v1598_v23, %v1067_v9 }
0x1313   :  { %v1088_v34 = vrot.slane %v1932_v32, 7 }
0x1315   :  { %v1089_v35 = vsel %vm212_vm3, %v1088_v34, %v1934_v33 }
0x1316   :  { %1090 = vrot.lane.b32.xlu0 %v1089_v35, %s1722_s1 }
0x1388   :  { %v1091_v38 = vpop.permute.xlu0 %1090 }
0x1389   :  { %1429 = vmatmul.mubr.msk.f32.vlgmr.msra.gmra.mrb[6].mxu1 %vm58_vm2, %v1091_v38 }
0x145c   :  { %v1160_v41 = vpop.f32.mrb[6].mxu1 }
0x145d   :  { %v1165_v42 = vrot.slane %v1160_v41, 1  ;;  %v1168_v44 = vadd.f32 %v1160_v41, %v1082_v39  ;;  %v1430_v45 = vpop.f32.mrb[7].mxu1 }
0x145f   :  { %v1169_v47 = vadd.f32 %v1165_v42, %v1083_v40  ;;  %1603 = vtanh.f32 %v1168_v44  ;;  %v1301_v50 = vmul.f32 -1.442695, %v1168_v44 }
0x1461   :  { %1605 = vtanh.f32 %v1169_v47  ;;  %v1302_v51 = vmul.f32 -1.442695, %v1169_v47 }
0x1462   :  { %1607 = vpow2.f32 %v1301_v50 }
0x1463   :  { %1609 = vpow2.f32 %v1302_v51 }
0x1469   :  { %v1604_v48 = vpop.eup %1603 }
0x146a   :  { %1188 = vrot.lane.b32.xlu0 %v1604_v48, %s1723_s10 }
0x146b   :  { %v1606_v49 = vpop.eup %1605 }
0x146c   :  { %1190 = vrot.lane.b32.xlu1 %v1606_v49, %s1723_s10  ;;  %v1608_v52 = vpop.eup %1607 }
0x146d   :  { %v1610_v53 = vpop.eup %1609  ;;  %v1176_v56 = vadd.f32 1.0, %v1608_v52 }
0x146e   :  { %v1177_v57 = vadd.f32 1.0, %v1610_v53 }
0x146f   :  { %1611 = vrcp.f32 %v1176_v56 }
0x1470   :  { %1613 = vrcp.f32 %v1177_v57 }
0x1479   :  { %v1612_v60 = vpop.eup %1611 }
0x147a   :  { %v1614_v63 = vpop.eup %1613  ;;  %v1184_v4 = vmul.f32 %v1612_v60, %v1058_v28 }
0x147b   :  { %v1185_v8 = vmul.f32 %v1614_v63, %v1059_v5 }
0x14dc   :  { %v1189_v61 = vpop.permute.xlu0 %1188 }
0x14dd   :  { %v1194_v62 = vmul.f32 %v1612_v60, %v1189_v61 }
0x14de   :  { %v1191_v2 = vpop.permute.xlu1 %1190 }
0x14df   :  { %1198 = vrot.lane.b32.xlu0 %v1194_v62, %s1722_s1  ;;  %v1195_v3 = vmul.f32 %v1614_v63, %v1191_v2 }
0x14e1   :  { %1200 = vrot.lane.b32.xlu1 %v1195_v3, %s1722_s1 }
0x1551   :  { %v1199_v6 = vpop.permute.xlu0 %1198 }
0x1552   :  { %v1204_v7 = vadd.f32 %v1199_v6, %v1184_v4 }
0x1553   :  { %v1201_v10 = vpop.permute.xlu1 %1200 }
0x1554   :  { %1615 = vtanh.f32 %v1204_v7  ;;  %v1205_v11 = vadd.f32 %v1201_v10, %v1185_v8 }
0x1556   :  { %1617 = vtanh.f32 %v1205_v11  ;;  %v1237_v12 = vrot.slane %v1205_v11, 7 }
0x1558   :  { %v1238_v13 = vsel %vm212_vm3, %v1237_v12, %v1204_v7 }
0x155e   :  { %v1616_v14 = vpop.eup %1615 }
0x155f   :  { %1210 = vrot.lane.b32.xlu0 %v1616_v14, %s1723_s10 }
0x1560   :  { %v1618_v15 = vpop.eup %1617 }
0x1561   :  { %1212 = vrot.lane.b32.xlu1 %v1618_v15, %s1723_s10 }
0x1563   :  { %198 = vrot.lane.b32.xlu0 %v1814_v43, %s1722_s1 }
0x1565   :  { %196 = vrot.lane.b32.xlu1 %v1817_v46, %s1722_s1 }
0x1567   :  { %346 = vrot.lane.b32.xlu0 %v1835_v20, %s1722_s1 }
0x1569   :  { %344 = vrot.lane.b32.xlu1 %v1837_v21, %s1722_s1 }
0x156b   :  { %492 = vrot.lane.b32.xlu0 %v1856_v58, %s1722_s1 }
0x156d   :  { %490 = vrot.lane.b32.xlu1 %v1858_v59, %s1722_s1 }
0x156f   :  { %638 = vrot.lane.b32.xlu0 %v1877_v36, %s1722_s1 }
0x1571   :  { %636 = vrot.lane.b32.xlu1 %v1879_v37, %s1722_s1 }
0x1573   :  { %784 = vrot.lane.b32.xlu0 %v1897_v16, %s1722_s1 }
0x1575   :  { %782 = vrot.lane.b32.xlu1 %v1899_v17, %s1722_s1 }
0x1577   :  { %930 = vrot.lane.b32.xlu0 %v1917_v54, %s1722_s1 }
0x1579   :  { %928 = vrot.lane.b32.xlu1 %v1919_v55, %s1722_s1 }
0x157b   :  { %1076 = vrot.lane.b32.xlu0 %v1932_v32, %s1722_s1 }
0x157d   :  { %1074 = vrot.lane.b32.xlu1 %v1934_v33, %s1722_s1 }
0x15d1   :  { %v1211_v43 = vpop.permute.xlu0 %1210 }
0x15d2   :  { %v1216_v46 = vmul.f32 %v1612_v60, %v1211_v43 }
0x15d3   :  { %v1213_v20 = vpop.permute.xlu1 %1212 }
0x15d4   :  { %1220 = vrot.lane.b32.xlu1 %v1216_v46, %s1722_s1  ;;  %v1217_v21 = vmul.f32 %v1614_v63, %v1213_v20 }
0x15d5   :  { %v199_v58 = vpop.permute.xlu0 %198 }
0x15d6   :  { %204 = vst.msk [vmem:[#allocation9 + $0x8] sm:$0x1] %vm202_vm4, %v199_v58  ;;  %v1228_v59 = vrot.slane %v1217_v21, 7  ;;  %1222 = vrot.lane.b32.xlu0 %v1217_v21, %s1722_s1 }
0x15d7   :  { %v197_v36 = vpop.permute.xlu1 %196 }
0x15d8   :  { %1239 = vrot.lane.b32.xlu1 %v1238_v13, %s1724_s11  ;;  %203 = vst.msk [vmem:[#allocation9] sm:$0x1] %vm202_vm4, %v197_v36  ;;  %v1229_v16 = vsel %vm212_vm3, %v1228_v59, %v1216_v46 }
0x15d9   :  { %v347_v37 = vpop.permute.xlu0 %346 }
0x15da   :  { %351 = vst.msk [vmem:[#allocation9 + $0x9] sm:$0x1] %vm202_vm4, %v347_v37  ;;  %1230 = vrot.lane.b32.xlu0 %v1229_v16, %s1722_s1 }
0x15db   :  { %v345_v17 = vpop.permute.xlu1 %344 }
0x15dc   :  { %350 = vst.msk [vmem:[#allocation9 + $0x1] sm:$0x1] %vm202_vm4, %v345_v17 }
0x15dd   :  { %v493_v54 = vpop.permute.xlu0 %492 }
0x15de   :  { %497 = vst.msk [vmem:[#allocation9 + $0xa] sm:$0x1] %vm202_vm4, %v493_v54 }
0x15df   :  { %v491_v55 = vpop.permute.xlu1 %490 }
0x15e0   :  { %496 = vst.msk [vmem:[#allocation9 + $0x2] sm:$0x1] %vm202_vm4, %v491_v55 }
0x15e1   :  { %v639_v18 = vpop.permute.xlu0 %638 }
0x15e2   :  { %643 = vst.msk [vmem:[#allocation9 + $0xb] sm:$0x1] %vm202_vm4, %v639_v18 }
0x15e3   :  { %v637_v19 = vpop.permute.xlu1 %636 }
0x15e4   :  { %642 = vst.msk [vmem:[#allocation9 + $0x3] sm:$0x1] %vm202_vm4, %v637_v19 }
0x15e5   :  { %v785_v22 = vpop.permute.xlu0 %784 }
0x15e6   :  { %789 = vst.msk [vmem:[#allocation9 + $0xc] sm:$0x1] %vm202_vm4, %v785_v22 }
0x15e7   :  { %v783_v23 = vpop.permute.xlu1 %782 }
0x15e8   :  { %788 = vst.msk [vmem:[#allocation9 + $0x4] sm:$0x1] %vm202_vm4, %v783_v23 }
0x15e9   :  { %v931_v24 = vpop.permute.xlu0 %930 }
0x15ea   :  { %935 = vst.msk [vmem:[#allocation9 + $0xd] sm:$0x1] %vm202_vm4, %v931_v24 }
0x15eb   :  { %v929_v25 = vpop.permute.xlu1 %928 }
0x15ec   :  { %934 = vst.msk [vmem:[#allocation9 + $0x5] sm:$0x1] %vm202_vm4, %v929_v25 }
0x15ed   :  { %v1077_v26 = vpop.permute.xlu0 %1076 }
0x15ee   :  { %1081 = vst.msk [vmem:[#allocation9 + $0xe] sm:$0x1] %vm202_vm4, %v1077_v26 }
0x15ef   :  { %v1075_v27 = vpop.permute.xlu1 %1074 }
0x15f0   :  { %1080 = vst.msk [vmem:[#allocation9 + $0x6] sm:$0x1] %vm202_vm4, %v1075_v27 }
0x1646   :  { %v1221_v28 = vpop.permute.xlu1 %1220 }
0x1647   :  { %1226 = vst.msk [vmem:[#allocation9 + $0x7] sm:$0x1] %vm202_vm4, %v1221_v28 }
0x1648   :  { %v1223_v29 = vpop.permute.xlu0 %1222 }
0x1649   :  { %1227 = vst.msk [vmem:[#allocation9 + $0xf] sm:$0x1] %vm202_vm4, %v1223_v29 }
0x164a   :  { %v1240_v30 = vpop.permute.xlu1 %1239 }
0x164b   :  { %1242 = vst.msk [vmem:[#allocation3] sm:$0x3] %vm47_vm0, %v1240_v30  ;;  %1246 = vst.msk [vmem:[#allocation10] sm:$0x3] %vm47_vm0, %v1240_v30 }
0x164c   :  { %1674 = shalt.err (!%p1671_p6)
}
0x164d   :  { %s1675_s19 = scalar_lea.hbm %s2035_s2, 256 }
0x164e   :  { %p1676_p7 = scmp.ne.s32.totalorder %s2035_s2, %s1675_s19  ;;  %p1679_p8 = scmp.lt.u32.totalorder %s1675_s19, %s2035_s2 }
0x1650   :  { %p1681_p9 = pnand %p1679_p8, %p1676_p7 }
0x1652   :  { %1684 = shalt.err (!%p1681_p9)
}
0x1653   :  { %1258 = dma.vmem_to_hbm [thread:$0]  %s1253_s13, 256, %s2035_s2, [#allocation6], %s1716_s22, %s1716_s22, %s1717_s23  }
0x1654   :  { %s1685_s28 = scalar_lea.vmem %s1995_s15, 32  ;;  %p1690_p11 = scmp.lt.s32.totalorder %s1995_s15, %s1995_s15 }
0x1655   :  { %p1686_p10 = scmp.ne.s32.totalorder %s1995_s15, %s1685_s28  ;;  %p1691_p12 = scmp.lt.s32.totalorder %s1685_s28, %s1685_s28 }
0x1657   :  { %p1692_p13 = por %p1691_p12, %p1690_p11 }
0x1659   :  { %p1693_p0 = pnand %p1692_p13, %p1686_p10 }
0x165b   :  { %1696 = shalt.err (!%p1693_p0)
}
0x165c   :  { %s1697_s4 = scalar_lea.hbm %s2036_s3, 32 }
0x165d   :  { %p1698_p1 = scmp.ne.s32.totalorder %s2036_s3, %s1697_s4  ;;  %p1701_p2 = scmp.lt.u32.totalorder %s1697_s4, %s2036_s3 }
0x165f   :  { %p1703_p3 = pnand %p1701_p2, %p1698_p1 }
0x1661   :  { %1706 = shalt.err (!%p1703_p3)
}
0x1662   :  { %1268 = dma.vmem_to_hbm [thread:$0]  %s1995_s15, 32, %s2036_s3, [#allocation11]   ;;  %v1231_v5 = vpop.permute.xlu0 %1230 }
0x1663   :  { %1234 = vst.msk [vmem:[#allocation2] sm:$0x3] %vm47_vm0, %v1231_v5 }
0x1664   :  { %1711 = dma.done.wait [#allocation6], 256  }
0x1665   :  { %1712 = vsyncadd [#allocation6], 4294967040 }
0x1666   :  { %1713 = dma.done.wait [#allocation11], 32  }
0x1667   :  { %1714 = vsyncadd [#allocation11], 4294967264 }
0x1668   :  { %1275 = vsyncpa [#allocation5], 1 }
0x1669   :  { %1276 = vsyncpa [#allocation8], 1 }
0x166a   :  { %1277 = vsyncpa [#allocation6], 1 }
0x166b   :  { %1278 = vsyncpa [#allocation11], 1 }

</bundles_post_ra>
